<compile_context>
chip_gen: v7x
topology: tpu7x:2x2x1
jax: 0.10.0
libtpu: 0.0.40
codegen_flags: <defaults>
</compile_context>

<pallas_src>
import jax
import jax.numpy as jnp
import numpy as np
from jax.experimental import pallas as pl
from jax.experimental.pallas import tpu as pltpu


def _vmem_limit(need_bytes):
    """Explicit scoped-VMEM limit: >= the 32 MiB default, <= 56 MiB so the
    same setting is valid on v7x (64 MiB physical) as well as v5e/v6e."""
    return int(min(max(need_bytes + (8 << 20), 32 << 20), 56 << 20))


# ----------------------------------------------------------------------------
# Generic tiled matmul + bias kernel:  out = A @ B + bias
# Used for (a) the hoisted, time-parallel x @ W_ih^T + b projection and
# (b) the output projection (T*B, H) @ (H, V) + lin_b.
# ----------------------------------------------------------------------------
def _matmul_bias_kernel(a_ref, b_ref, bias_ref, o_ref):
    a = a_ref[...]
    if a.dtype != jnp.bfloat16:          # trace-time branch: cast only if the
        a = a.astype(jnp.bfloat16)       # producer did not already emit bf16
    acc = jnp.dot(a, b_ref[...], preferred_element_type=jnp.float32)
    o_ref[...] = (acc + bias_ref[...]).astype(o_ref.dtype)


def matmul_bias(a, b, bias, *, tile_m=512, tile_n=2048, out_dtype=jnp.float32):
    """a: (M, K) f32/bf16, b: (K, N) bf16, bias: (1, N) f32 -> (M, N) out_dtype.

    No wrapper-side padding / casting.  K is a single full block, so boundary
    garbage from ragged M/N tiles only lands in rows/cols that Pallas clips on
    the output write-back.  Grid ordering is chosen so that the larger operand
    is NOT re-streamed from HBM once per outer tile.
    """
    M, K = a.shape
    _, N = b.shape

    tm = tile_m if M > tile_m else M          # full-dim block if small
    tn = tile_n if N > tile_n else N
    n_m = pl.cdiv(M, tm)
    n_n = pl.cdiv(N, tn)

    a_item = jnp.dtype(a.dtype).itemsize
    out_item = jnp.dtype(out_dtype).itemsize
    a_bytes = M * K * a_item
    b_bytes = K * N * 2                       # weights are bf16

    # Extra HBM traffic for each grid ordering (the inner-axis-constant block
    # stays resident; the other operand is re-read once per outer tile).
    cost_mn = b_bytes * (n_m - 1)             # N innermost -> weight re-read
    cost_nm = a_bytes * (n_n - 1)             # M innermost -> A re-read

    if cost_mn <= cost_nm:
        grid = (n_m, n_n)
        a_map = lambda i, j: (i, 0)
        b_map = lambda i, j: (0, j)
        bias_map = lambda i, j: (0, j)
        o_map = lambda i, j: (i, j)
    else:
        grid = (n_n, n_m)
        a_map = lambda j, i: (i, 0)
        b_map = lambda j, i: (0, j)
        bias_map = lambda j, i: (0, j)
        o_map = lambda j, i: (i, j)

    # Double-buffered working-set estimate (all four specs).
    need = 2 * (tm * K * a_item + K * tn * 2 + tn * 4 + tm * tn * out_item)

    return pl.pallas_call(
        _matmul_bias_kernel,
        out_shape=jax.ShapeDtypeStruct((M, N), out_dtype),
        grid_spec=pltpu.PrefetchScalarGridSpec(
            num_scalar_prefetch=0,
            grid=grid,
            in_specs=[
                pl.BlockSpec((tm, K), a_map),
                pl.BlockSpec((K, tn), b_map),
                pl.BlockSpec((1, tn), bias_map),
            ],
            out_specs=pl.BlockSpec((tm, tn), o_map),
        ),
        compiler_params=pltpu.CompilerParams(
            dimension_semantics=("parallel", "parallel"),
            vmem_limit_bytes=_vmem_limit(need)),
    )(a, b, bias)


# ----------------------------------------------------------------------------
# LSTM recurrence kernel.  pre_gates already contains x @ W_ih^T + (b_ih+b_hh)
# (bf16), so each time step only does the truly sequential h_{t-1} @ W_hh^T.
# W_hh^T is DMA'd once per batch-block into a single VMEM scratch copy.
# Gate order is [i, f, o | g]: one sigmoid over a contiguous (B, 3H) slice.
# ----------------------------------------------------------------------------
def _lstm_recurrence_kernel(pg_ref, whh_hbm, allh_ref, hT_ref, cT_ref,
                            whh_vmem, whh_sem, h_sc, c_sc):
    t_idx = pl.program_id(1)

    @pl.when(t_idx == 0)
    def _():
        # Load W_hh^T once per batch-block (safe under megacore batch split:
        # each core's scratch gets its own copy), overlap with h/c zero-init.
        cp = pltpu.make_async_copy(whh_hbm, whh_vmem, whh_sem)
        cp.start()
        h_sc[...] = jnp.zeros_like(h_sc)
        c_sc[...] = jnp.zeros_like(c_sc)
        cp.wait()

    H = h_sc.shape[1]
    Tb = pg_ref.shape[0]

    def step(tt, carry):
        h_prev, c_prev = carry
        # Sequential part only: h @ W_hh^T (bf16 MXU, f32 accumulate).
        gates = (pg_ref[tt].astype(jnp.float32)
                 + jnp.dot(h_prev.astype(jnp.bfloat16), whh_vmem[...],
                           preferred_element_type=jnp.float32))   # (B, 4H) f32
        sig = jax.nn.sigmoid(gates[:, :3 * H])       # [i | f | o] in one call
        i_g = sig[:, 0 * H:1 * H]
        f_g = sig[:, 1 * H:2 * H]
        o_g = sig[:, 2 * H:3 * H]
        g_g = jnp.tanh(gates[:, 3 * H:4 * H])
        c_new = f_g * c_prev + i_g * g_g
        h_new = o_g * jnp.tanh(c_new)
        allh_ref[tt] = h_new.astype(allh_ref.dtype)  # bf16 activation stream
        return (h_new, c_new)

    # Bounded unroll (<=8) keeps vreg live ranges in check while still giving
    # the LLO scheduler a window.
    h_fin, c_fin = jax.lax.fori_loop(0, Tb, step, (h_sc[...], c_sc[...]),
                                     unroll=int(min(8, Tb)))

    h_sc[...] = h_fin
    c_sc[...] = c_fin

    @pl.when(t_idx == pl.num_programs(1) - 1)
    def _():
        hT_ref[...] = h_fin.astype(hT_ref.dtype)
        cT_ref[...] = c_fin.astype(cT_ref.dtype)


def _pick_time_block(T, Bb, H, budget_bytes):
    """Largest Tb in {32,16,8,4,2,1} dividing T whose double-buffered working
    set fits the VMEM budget."""
    for cand in (32, 16, 8, 4, 2, 1):
        if T % cand:
            continue
        need = (2 * cand * Bb * 4 * H * 2      # pre_gates in  (bf16, 2 bufs)
                + 2 * cand * Bb * H * 2        # all_hidden out (bf16, 2 bufs)
                + 2 * 2 * Bb * H * 4           # h_T / c_T outs
                + H * 4 * H * 2                # W_hh^T scratch (single copy)
                + 2 * Bb * H * 4)              # h/c scratch
        if need <= budget_bytes:
            return cand, need
    return 1, 0


def lstm_recurrence(pre_gates, w_hh_t):
    """pre_gates: (T, B, 4H) bf16, w_hh_t: (H, 4H) bf16 ->
       (all_hidden (T,B,H) bf16, h_T (B,H) f32, c_T (B,H) f32)."""
    T, B, H4 = pre_gates.shape
    H = H4 // 4

    # Batch-block axis: split across the two v7x TensorCores when the batch is
    # large enough that per-core MXU rows stay reasonable (no-op otherwise).
    n_b = 2 if (B >= 64 and B % 16 == 0) else 1
    Bb = B // n_b

    budget = 40 << 20                           # ~40 MiB: fits v7x's 64 MiB
    Tb, need = _pick_time_block(T, Bb, H, budget)

    out_shapes = (
        jax.ShapeDtypeStruct((T, B, H), jnp.bfloat16),
        jax.ShapeDtypeStruct((B, H), jnp.float32),
        jax.ShapeDtypeStruct((B, H), jnp.float32),
    )
    return pl.pallas_call(
        _lstm_recurrence_kernel,
        out_shape=out_shapes,
        grid_spec=pltpu.PrefetchScalarGridSpec(
            num_scalar_prefetch=0,
            grid=(n_b, T // Tb),
            in_specs=[
                pl.BlockSpec((Tb, Bb, 4 * H), lambda b, t: (t, b, 0)),  # pre_g
                pl.BlockSpec(memory_space=pl.ANY),                      # W_hh^T
            ],
            out_specs=[
                pl.BlockSpec((Tb, Bb, H), lambda b, t: (t, b, 0)),      # all_h
                pl.BlockSpec((Bb, H), lambda b, t: (b, 0)),             # h_T
                pl.BlockSpec((Bb, H), lambda b, t: (b, 0)),             # c_T
            ],
            scratch_shapes=[
                pltpu.VMEM((H, 4 * H), jnp.bfloat16),                   # W_hh^T
                pltpu.SemaphoreType.DMA,                                # its DMA
                pltpu.VMEM((Bb, H), jnp.float32),                       # h state
                pltpu.VMEM((Bb, H), jnp.float32),                       # c state
            ],
        ),
        compiler_params=pltpu.CompilerParams(
            # batch blocks independent; time is strictly sequential
            dimension_semantics=("parallel", "arbitrary"),
            vmem_limit_bytes=_vmem_limit(need)),
    )(pre_gates, w_hh_t)


# ----------------------------------------------------------------------------
# Full RNNLM forward (uses pre-transposed / bf16-prepared params).
# ----------------------------------------------------------------------------
def rnnlm_forward(tokens, prep):
    """tokens: (T, B) int32.  Returns (logits (T,B,V), (h_n, c_n))."""
    # TODO(synk): embedding gather stays as XLA jnp.take (irregular gather);
    # a manual DMA-gather Pallas kernel is possible but unnecessary here.
    x = jnp.take(prep["embedding"], tokens, axis=0)      # (T, B, E) f32
    T, B, _ = x.shape

    h_finals, c_finals = [], []
    layer_in = x
    for (w_ih_t, w_hh_t, bias) in prep["lstm"]:
        in_dim = w_ih_t.shape[0]
        H = w_hh_t.shape[0]
        # Time-parallel input projection: one big MXU matmul over T*B rows,
        # emitted directly in bf16 (the only consumer is the bf16 recurrence).
        pre = matmul_bias(layer_in.reshape(T * B, in_dim), w_ih_t, bias,
                          out_dtype=jnp.bfloat16)
        pre = pre.reshape(T, B, 4 * H)
        # Sequential recurrence (only h @ W_hh^T per step).
        layer_in, h_T, c_T = lstm_recurrence(pre, w_hh_t)
        h_finals.append(h_T)
        c_finals.append(c_T)

    H = layer_in.shape[-1]
    V = prep["lin_w_t"].shape[1]
    logits = matmul_bias(layer_in.reshape(T * B, H),
                         prep["lin_w_t"], prep["lin_b"],
                         out_dtype=jnp.float32).reshape(T, B, V)
    h_n = jnp.stack(h_finals, axis=0)   # (num_layers, B, H)
    c_n = jnp.stack(c_finals, axis=0)
    return logits, (h_n, c_n)


# ----------------------------------------------------------------------------
# Pure-JAX f32 reference (PyTorch-layout params, PyTorch [i,f,g,o] gate order).
# ----------------------------------------------------------------------------
def rnnlm_reference(tokens, params):
    x = jnp.take(params["embedding"], tokens, axis=0)
    T, B, _ = x.shape
    h_finals, c_finals = [], []
    layer_in = x
    for (w_ih, w_hh, bias) in params["lstm"]:
        H = w_hh.shape[1]

        def step(carry, x_t):
            h, c = carry
            gates = x_t @ w_ih.T + h @ w_hh.T + bias[0]
            i_g = jax.nn.sigmoid(gates[:, 0 * H:1 * H])
            f_g = jax.nn.sigmoid(gates[:, 1 * H:2 * H])
            g_g = jnp.tanh(gates[:, 2 * H:3 * H])
            o_g = jax.nn.sigmoid(gates[:, 3 * H:4 * H])
            c_new = f_g * c + i_g * g_g
            h_new = o_g * jnp.tanh(c_new)
            return (h_new, c_new), h_new

        init = (jnp.zeros((B, H), jnp.float32), jnp.zeros((B, H), jnp.float32))
        (h_T, c_T), all_h = jax.lax.scan(step, init, layer_in)
        h_finals.append(h_T)
        c_finals.append(c_T)
        layer_in = all_h
    logits = layer_in @ params["lin_w"].T + params["lin_b"][0]
    return logits, (jnp.stack(h_finals, 0), jnp.stack(c_finals, 0))


# ----------------------------------------------------------------------------
# Parameters: canonical PyTorch-layout f32, plus a one-time "prepare" step that
# pre-transposes, repacks gate order to [i, f, o, g] and casts matmul weights
# to bf16 (layout plumbing done once, outside the kernels / forward pass).
# ----------------------------------------------------------------------------
def make_params(key, vocab_size, embed_dim, hidden, num_layers):
    keys = jax.random.split(key, 2 + 4 * num_layers + 2)
    ki = iter(keys)
    scale = 0.1
    params = {}
    params["embedding"] = scale * jax.random.normal(
        next(ki), (vocab_size, embed_dim), jnp.float32)

    lstm = []
    in_dim = embed_dim
    for _ in range(num_layers):
        w_ih = scale * jax.random.normal(next(ki), (4 * hidden, in_dim), jnp.float32)
        w_hh = scale * jax.random.normal(next(ki), (4 * hidden, hidden), jnp.float32)
        b_ih = scale * jax.random.normal(next(ki), (4 * hidden,), jnp.float32)
        b_hh = scale * jax.random.normal(next(ki), (4 * hidden,), jnp.float32)
        lstm.append((w_ih, w_hh, (b_ih + b_hh).reshape(1, 4 * hidden)))
        in_dim = hidden
    params["lstm"] = lstm

    params["lin_w"] = scale * jax.random.normal(next(ki), (vocab_size, hidden), jnp.float32)
    params["lin_b"] = scale * jax.random.normal(next(ki), (1, vocab_size), jnp.float32)
    return params


def _repack_ifog(w, axis):
    """PyTorch LSTM packs gates [i; f; g; o] along `axis`; repack to
    [i; f; o; g] so the sigmoid gates are contiguous in the kernel."""
    i, f, g, o = jnp.split(w, 4, axis=axis)
    return jnp.concatenate([i, f, o, g], axis=axis)


def prepare_params(params):
    # TODO(synk): for hidden sizes not a multiple of 128, additionally padding
    # H to a lane-aligned size would remove masked stores / gate-slice
    # relayouts; skipped here to keep parameter semantics 1:1 with PyTorch.
    prep = {"embedding": params["embedding"]}
    lstm = []
    for (w_ih, w_hh, bias) in params["lstm"]:
        w_ih_r = _repack_ifog(w_ih, axis=0)           # (4H, in)  [i,f,o,g]
        w_hh_r = _repack_ifog(w_hh, axis=0)           # (4H, H)
        bias_r = _repack_ifog(bias, axis=1)           # (1, 4H)
        lstm.append((jnp.asarray(w_ih_r.T, jnp.bfloat16),   # (in, 4H)
                     jnp.asarray(w_hh_r.T, jnp.bfloat16),   # (H, 4H)
                     jnp.asarray(bias_r, jnp.float32)))     # (1, 4H)
    prep["lstm"] = lstm
    prep["lin_w_t"] = jnp.asarray(params["lin_w"].T, jnp.bfloat16)   # (H, V)
    prep["lin_b"] = jnp.asarray(params["lin_b"], jnp.float32)        # (1, V)
    return prep


if __name__ == "__main__":
    # Small shapes consistent with the module's forward.
    SEQ_LEN = 8
    BATCH = 2
    VOCAB = 40
    EMBED = 16
    HIDDEN = 32
    NUM_LAYERS = 3

    key = jax.random.PRNGKey(0)
    pkey, tkey = jax.random.split(key)
    params = make_params(pkey, VOCAB, EMBED, HIDDEN, NUM_LAYERS)
    prep = prepare_params(params)
    tokens = jax.random.randint(tkey, (SEQ_LEN, BATCH), 0, VOCAB, dtype=jnp.int32)

    fwd = jax.jit(rnnlm_forward)
    logits, (h_n, c_n) = fwd(tokens, prep)
    jax.block_until_ready((logits, h_n, c_n))

    # Sanity check against the pure-JAX f32 reference (tolerance loosened for
    # bf16 MXU inputs and bf16 pre_gates / all_hidden activation streams).
    ref_logits, (ref_h, ref_c) = rnnlm_reference(tokens, params)
    np.testing.assert_allclose(np.asarray(logits), np.asarray(ref_logits),
                               rtol=2e-2, atol=2e-2)
    np.testing.assert_allclose(np.asarray(h_n), np.asarray(ref_h),
                               rtol=2e-2, atol=2e-2)
    np.testing.assert_allclose(np.asarray(c_n), np.asarray(ref_c),
                               rtol=2e-2, atol=2e-2)

    assert logits.shape == (SEQ_LEN, BATCH, VOCAB)
    assert h_n.shape == (NUM_LAYERS, BATCH, HIDDEN)
    assert c_n.shape == (NUM_LAYERS, BATCH, HIDDEN)
    print("KERNEL_OK")
</pallas_src>

<mosaic_0001>
module attributes {stable_mosaic.version = 11 : i64} {
  func.func @_matmul_bias_kernel(%arg0: i32, %arg1: i32, %arg2: memref<16x16xf32, #tpu.memory_space<vmem>>, %arg3: memref<16x128xbf16, #tpu.memory_space<vmem>>, %arg4: memref<1x128xf32, #tpu.memory_space<vmem>>, %arg5: memref<16x128xbf16, #tpu.memory_space<vmem>>) attributes {dimension_semantics = [#tpu.dimension_semantics<parallel>, #tpu.dimension_semantics<parallel>], iteration_bounds = array<i64: 1, 1>, scalar_prefetch = 0 : i64, scratch_operands = 0 : i64, tpu.core_type = #tpu.core_type<tc>, window_params = [{transform_indices = @transform_0, window_bounds = array<i64: 16, 16>}, {transform_indices = @transform_1, window_bounds = array<i64: 16, 128>}, {transform_indices = @transform_2, window_bounds = array<i64: 1, 128>}, {transform_indices = @transform_3, window_bounds = array<i64: 16, 128>}]} {
    %c0 = arith.constant 0 : index
    %c0_0 = arith.constant 0 : index
    %0 = vector.load %arg2[%c0, %c0_0] : memref<16x16xf32, #tpu.memory_space<vmem>>, vector<16x16xf32>
    %1 = arith.truncf %0 : vector<16x16xf32> to vector<16x16xbf16>
    %c0_1 = arith.constant 0 : index
    %c0_2 = arith.constant 0 : index
    %2 = vector.load %arg3[%c0_1, %c0_2] : memref<16x128xbf16, #tpu.memory_space<vmem>>, vector<16x128xbf16>
    %cst = arith.constant dense<0.000000e+00> : vector<16x128xf32>
    %3 = tpu.matmul %1, %2, %cst {dimension_numbers = #tpu.dot_dimension_numbers<[1], [0], [0], [1], [0, 0, 1, 1], [], []>} : vector<16x16xbf16>, vector<16x128xbf16>, vector<16x128xf32> -> vector<16x128xf32>
    %c0_3 = arith.constant 0 : index
    %c0_4 = arith.constant 0 : index
    %4 = vector.load %arg4[%c0_3, %c0_4] : memref<1x128xf32, #tpu.memory_space<vmem>>, vector<1x128xf32>
    %5 = vector.broadcast %4 : vector<1x128xf32> to vector<16x128xf32>
    %6 = arith.addf %3, %5 : vector<16x128xf32>
    %7 = arith.truncf %6 : vector<16x128xf32> to vector<16x128xbf16>
    %c0_5 = arith.constant 0 : index
    %c0_6 = arith.constant 0 : index
    %8 = vector.load %arg5[%c0_5, %c0_6] : memref<16x128xbf16, #tpu.memory_space<vmem>>, vector<16x128xbf16>
    tpu.vector_store %arg5[%c0_5, %c0_6], %7 {strides = array<i32>} : memref<16x128xbf16, #tpu.memory_space<vmem>>, vector<16x128xbf16>,
    return
  }
  func.func @transform_0(%arg0: i32, %arg1: i32) -> (i32, i32) {
    %c0_i32 = arith.constant 0 : i32
    %c0_i32_0 = arith.constant 0 : i32
    return %arg0, %c0_i32 : i32, i32
  }
  func.func @transform_1(%arg0: i32, %arg1: i32) -> (i32, i32) {
    %c0_i32 = arith.constant 0 : i32
    %c0_i32_0 = arith.constant 0 : i32
    return %c0_i32, %arg1 : i32, i32
  }
  func.func @transform_2(%arg0: i32, %arg1: i32) -> (i32, i32) {
    %c0_i32 = arith.constant 0 : i32
    %c0_i32_0 = arith.constant 0 : i32
    return %c0_i32, %arg1 : i32, i32
  }
  func.func @transform_3(%arg0: i32, %arg1: i32) -> (i32, i32) {
    %c0_i32 = arith.constant 0 : i32
    return %arg0, %arg1 : i32, i32
  }
}

module attributes {stable_mosaic.version = 11 : i64} {
  func.func @_matmul_bias_kernel(%arg0: i32, %arg1: i32, %arg2: memref<16x32xbf16, #tpu.memory_space<vmem>>, %arg3: memref<32x40xbf16, #tpu.memory_space<vmem>>, %arg4: memref<1x40xf32, #tpu.memory_space<vmem>>, %arg5: memref<16x40xf32, #tpu.memory_space<vmem>>) attributes {dimension_semantics = [#tpu.dimension_semantics<parallel>, #tpu.dimension_semantics<parallel>], iteration_bounds = array<i64: 1, 1>, scalar_prefetch = 0 : i64, scratch_operands = 0 : i64, tpu.core_type = #tpu.core_type<tc>, window_params = [{transform_indices = @transform_0, window_bounds = array<i64: 16, 32>}, {transform_indices = @transform_1, window_bounds = array<i64: 32, 40>}, {transform_indices = @transform_2, window_bounds = array<i64: 1, 40>}, {transform_indices = @transform_3, window_bounds = array<i64: 16, 40>}]} {
    %c0 = arith.constant 0 : index
    %c0_0 = arith.constant 0 : index
    %0 = vector.load %arg2[%c0, %c0_0] : memref<16x32xbf16, #tpu.memory_space<vmem>>, vector<16x32xbf16>
    %c0_1 = arith.constant 0 : index
    %c0_2 = arith.constant 0 : index
    %1 = vector.load %arg3[%c0_1, %c0_2] : memref<32x40xbf16, #tpu.memory_space<vmem>>, vector<32x40xbf16>
    %cst = arith.constant dense<0.000000e+00> : vector<16x40xf32>
    %2 = tpu.matmul %0, %1, %cst {dimension_numbers = #tpu.dot_dimension_numbers<[1], [0], [0], [1], [0, 0, 1, 1], [], []>} : vector<16x32xbf16>, vector<32x40xbf16>, vector<16x40xf32> -> vector<16x40xf32>
    %c0_3 = arith.constant 0 : index
    %c0_4 = arith.constant 0 : index
    %3 = vector.load %arg4[%c0_3, %c0_4] : memref<1x40xf32, #tpu.memory_space<vmem>>, vector<1x40xf32>
    %4 = vector.broadcast %3 : vector<1x40xf32> to vector<16x40xf32>
    %5 = arith.addf %2, %4 : vector<16x40xf32>
    %c0_5 = arith.constant 0 : index
    %c0_6 = arith.constant 0 : index
    %6 = vector.load %arg5[%c0_5, %c0_6] : memref<16x40xf32, #tpu.memory_space<vmem>>, vector<16x40xf32>
    tpu.vector_store %arg5[%c0_5, %c0_6], %5 {strides = array<i32>} : memref<16x40xf32, #tpu.memory_space<vmem>>, vector<16x40xf32>,
    return
  }
  func.func @transform_0(%arg0: i32, %arg1: i32) -> (i32, i32) {
    %c0_i32 = arith.constant 0 : i32
    %c0_i32_0 = arith.constant 0 : i32
    return %arg0, %c0_i32 : i32, i32
  }
  func.func @transform_1(%arg0: i32, %arg1: i32) -> (i32, i32) {
    %c0_i32 = arith.constant 0 : i32
    %c0_i32_0 = arith.constant 0 : i32
    return %c0_i32, %arg1 : i32, i32
  }
  func.func @transform_2(%arg0: i32, %arg1: i32) -> (i32, i32) {
    %c0_i32 = arith.constant 0 : i32
    %c0_i32_0 = arith.constant 0 : i32
    return %c0_i32, %arg1 : i32, i32
  }
  func.func @transform_3(%arg0: i32, %arg1: i32) -> (i32, i32) {
    %c0_i32 = arith.constant 0 : i32
    return %arg0, %arg1 : i32, i32
  }
}

module attributes {stable_mosaic.version = 11 : i64} {
  func.func @_matmul_bias_kernel(%arg0: i32, %arg1: i32, %arg2: memref<16x32xbf16, #tpu.memory_space<vmem>>, %arg3: memref<32x128xbf16, #tpu.memory_space<vmem>>, %arg4: memref<1x128xf32, #tpu.memory_space<vmem>>, %arg5: memref<16x128xbf16, #tpu.memory_space<vmem>>) attributes {dimension_semantics = [#tpu.dimension_semantics<parallel>, #tpu.dimension_semantics<parallel>], iteration_bounds = array<i64: 1, 1>, scalar_prefetch = 0 : i64, scratch_operands = 0 : i64, tpu.core_type = #tpu.core_type<tc>, window_params = [{transform_indices = @transform_0, window_bounds = array<i64: 16, 32>}, {transform_indices = @transform_1, window_bounds = array<i64: 32, 128>}, {transform_indices = @transform_2, window_bounds = array<i64: 1, 128>}, {transform_indices = @transform_3, window_bounds = array<i64: 16, 128>}]} {
    %c0 = arith.constant 0 : index
    %c0_0 = arith.constant 0 : index
    %0 = vector.load %arg2[%c0, %c0_0] : memref<16x32xbf16, #tpu.memory_space<vmem>>, vector<16x32xbf16>
    %c0_1 = arith.constant 0 : index
    %c0_2 = arith.constant 0 : index
    %1 = vector.load %arg3[%c0_1, %c0_2] : memref<32x128xbf16, #tpu.memory_space<vmem>>, vector<32x128xbf16>
    %cst = arith.constant dense<0.000000e+00> : vector<16x128xf32>
    %2 = tpu.matmul %0, %1, %cst {dimension_numbers = #tpu.dot_dimension_numbers<[1], [0], [0], [1], [0, 0, 1, 1], [], []>} : vector<16x32xbf16>, vector<32x128xbf16>, vector<16x128xf32> -> vector<16x128xf32>
    %c0_3 = arith.constant 0 : index
    %c0_4 = arith.constant 0 : index
    %3 = vector.load %arg4[%c0_3, %c0_4] : memref<1x128xf32, #tpu.memory_space<vmem>>, vector<1x128xf32>
    %4 = vector.broadcast %3 : vector<1x128xf32> to vector<16x128xf32>
    %5 = arith.addf %2, %4 : vector<16x128xf32>
    %6 = arith.truncf %5 : vector<16x128xf32> to vector<16x128xbf16>
    %c0_5 = arith.constant 0 : index
    %c0_6 = arith.constant 0 : index
    %7 = vector.load %arg5[%c0_5, %c0_6] : memref<16x128xbf16, #tpu.memory_space<vmem>>, vector<16x128xbf16>
    tpu.vector_store %arg5[%c0_5, %c0_6], %6 {strides = array<i32>} : memref<16x128xbf16, #tpu.memory_space<vmem>>, vector<16x128xbf16>,
    return
  }
  func.func @transform_0(%arg0: i32, %arg1: i32) -> (i32, i32) {
    %c0_i32 = arith.constant 0 : i32
    %c0_i32_0 = arith.constant 0 : i32
    return %arg0, %c0_i32 : i32, i32
  }
  func.func @transform_1(%arg0: i32, %arg1: i32) -> (i32, i32) {
    %c0_i32 = arith.constant 0 : i32
    %c0_i32_0 = arith.constant 0 : i32
    return %c0_i32, %arg1 : i32, i32
  }
  func.func @transform_2(%arg0: i32, %arg1: i32) -> (i32, i32) {
    %c0_i32 = arith.constant 0 : i32
    %c0_i32_0 = arith.constant 0 : i32
    return %c0_i32, %arg1 : i32, i32
  }
  func.func @transform_3(%arg0: i32, %arg1: i32) -> (i32, i32) {
    %c0_i32 = arith.constant 0 : i32
    return %arg0, %arg1 : i32, i32
  }
}

module attributes {stable_mosaic.version = 11 : i64} {
  func.func @_lstm_recurrence_kernel(%arg0: i32, %arg1: i32, %arg2: memref<8x2x128xbf16, #tpu.memory_space<vmem>>, %arg3: memref<32x128xbf16, #tpu.memory_space<any>>, %arg4: memref<8x2x32xbf16, #tpu.memory_space<vmem>>, %arg5: memref<2x32xf32, #tpu.memory_space<vmem>>, %arg6: memref<2x32xf32, #tpu.memory_space<vmem>>, %arg7: memref<32x128xbf16, #tpu.memory_space<vmem>>, %arg8: memref<!tpu.dma_semaphore, #tpu.memory_space<semaphore_mem>>, %arg9: memref<2x32xf32, #tpu.memory_space<vmem>>, %arg10: memref<2x32xf32, #tpu.memory_space<vmem>>) attributes {dimension_semantics = [#tpu.dimension_semantics<parallel>, #tpu.dimension_semantics<arbitrary>], iteration_bounds = array<i64: 1, 1>, scalar_prefetch = 0 : i64, scratch_operands = 4 : i64, tpu.core_type = #tpu.core_type<tc>, window_params = [{transform_indices = @transform_0, window_bounds = array<i64: 8, 2, 128>}, {}, {transform_indices = @transform_2, window_bounds = array<i64: 8, 2, 32>}, {transform_indices = @transform_3, window_bounds = array<i64: 2, 32>}, {transform_indices = @transform_4, window_bounds = array<i64: 2, 32>}]} {
    %c0_i32 = arith.constant 0 : i32
    %0 = arith.cmpi eq, %arg1, %c0_i32 : i32
    %1 = arith.extui %0 : i1 to i32
    %c0_i32_0 = arith.constant 0 : i32
    %2 = arith.cmpi ne, %1, %c0_i32_0 : i32
    scf.if %2 {
      tpu.enqueue_dma source(%arg3 : memref<32x128xbf16, #tpu.memory_space<any>>) target(%arg7 : memref<32x128xbf16, #tpu.memory_space<vmem>>) target_semaphore(%arg8 : memref<!tpu.dma_semaphore, #tpu.memory_space<semaphore_mem>>)
      %cst_74 = arith.constant 0.000000e+00 : f32
      %242 = vector.broadcast %cst_74 : f32 to vector<2x32xf32>
      %c0_75 = arith.constant 0 : index
      %c0_76 = arith.constant 0 : index
      %243 = vector.load %arg9[%c0_75, %c0_76] : memref<2x32xf32, #tpu.memory_space<vmem>>, vector<2x32xf32>
      tpu.vector_store %arg9[%c0_75, %c0_76], %242 {strides = array<i32>} : memref<2x32xf32, #tpu.memory_space<vmem>>, vector<2x32xf32>,
      %cst_77 = arith.constant 0.000000e+00 : f32
      %244 = vector.broadcast %cst_77 : f32 to vector<2x32xf32>
      %c0_78 = arith.constant 0 : index
      %c0_79 = arith.constant 0 : index
      %245 = vector.load %arg10[%c0_78, %c0_79] : memref<2x32xf32, #tpu.memory_space<vmem>>, vector<2x32xf32>
      tpu.vector_store %arg10[%c0_78, %c0_79], %244 {strides = array<i32>} : memref<2x32xf32, #tpu.memory_space<vmem>>, vector<2x32xf32>,
      tpu.wait_dma2 semaphore(%arg8 : memref<!tpu.dma_semaphore, #tpu.memory_space<semaphore_mem>>) src(%arg3 : memref<32x128xbf16, #tpu.memory_space<any>>) dst(%arg7 : memref<32x128xbf16, #tpu.memory_space<vmem>>)
    } else {
    }
    %c0 = arith.constant 0 : index
    %c0_1 = arith.constant 0 : index
    %3 = vector.load %arg9[%c0, %c0_1] : memref<2x32xf32, #tpu.memory_space<vmem>>, vector<2x32xf32>
    %c0_2 = arith.constant 0 : index
    %c0_3 = arith.constant 0 : index
    %4 = vector.load %arg10[%c0_2, %c0_3] : memref<2x32xf32, #tpu.memory_space<vmem>>, vector<2x32xf32>
    %c0_i32_4 = arith.constant 0 : i32
    %5 = arith.index_cast %c0_i32_4 : i32 to index
    %c0_5 = arith.constant 0 : index
    %c0_6 = arith.constant 0 : index
    %6 = vector.load %arg2[%5, %c0_5, %c0_6] : memref<8x2x128xbf16, #tpu.memory_space<vmem>>, vector<1x2x128xbf16>
    %7 = vector.shape_cast %6 : vector<1x2x128xbf16> to vector<2x128xbf16>
    %8 = arith.extf %7 : vector<2x128xbf16> to vector<2x128xf32>
    %9 = arith.truncf %3 : vector<2x32xf32> to vector<2x32xbf16>
    %c0_7 = arith.constant 0 : index
    %c0_8 = arith.constant 0 : index
    %10 = vector.load %arg7[%c0_7, %c0_8] : memref<32x128xbf16, #tpu.memory_space<vmem>>, vector<32x128xbf16>
    %cst = arith.constant dense<0.000000e+00> : vector<2x128xf32>
    %11 = tpu.matmul %9, %10, %cst {dimension_numbers = #tpu.dot_dimension_numbers<[1], [0], [0], [1], [0, 0, 1, 1], [], []>} : vector<2x32xbf16>, vector<32x128xbf16>, vector<2x128xf32> -> vector<2x128xf32>
    %12 = arith.addf %8, %11 : vector<2x128xf32>
    %13 = vector.extract_strided_slice %12 {offsets = [0, 0], sizes = [2, 96], strides = [1, 1]} : vector<2x128xf32> to vector<2x96xf32>
    %14 = arith.negf %13 : vector<2x96xf32>
    %15 = math.exp %14 : vector<2x96xf32>
    %cst_9 = arith.constant 1.000000e+00 : f32
    %16 = vector.broadcast %cst_9 : f32 to vector<2x96xf32>
    %17 = arith.addf %16, %15 : vector<2x96xf32>
    %18 = arith.divf %16, %17 : vector<2x96xf32>
    %19 = vector.extract_strided_slice %18 {offsets = [0, 0], sizes = [2, 32], strides = [1, 1]} : vector<2x96xf32> to vector<2x32xf32>
    %20 = vector.extract_strided_slice %18 {offsets = [0, 32], sizes = [2, 32], strides = [1, 1]} : vector<2x96xf32> to vector<2x32xf32>
    %21 = vector.extract_strided_slice %18 {offsets = [0, 64], sizes = [2, 32], strides = [1, 1]} : vector<2x96xf32> to vector<2x32xf32>
    %22 = vector.extract_strided_slice %12 {offsets = [0, 96], sizes = [2, 32], strides = [1, 1]} : vector<2x128xf32> to vector<2x32xf32>
    %23 = math.tanh %22 : vector<2x32xf32>
    %24 = arith.mulf %20, %4 : vector<2x32xf32>
    %25 = arith.mulf %19, %23 : vector<2x32xf32>
    %26 = arith.addf %24, %25 : vector<2x32xf32>
    %27 = math.tanh %26 : vector<2x32xf32>
    %28 = arith.mulf %21, %27 : vector<2x32xf32>
    %29 = arith.truncf %28 : vector<2x32xf32> to vector<2x32xbf16>
    %30 = arith.index_cast %c0_i32_4 : i32 to index
    %c0_10 = arith.constant 0 : index
    %c0_11 = arith.constant 0 : index
    %31 = vector.load %arg4[%30, %c0_10, %c0_11] : memref<8x2x32xbf16, #tpu.memory_space<vmem>>, vector<1x2x32xbf16>
    %32 = vector.shape_cast %31 : vector<1x2x32xbf16> to vector<2x32xbf16>
    %33 = vector.shape_cast %29 : vector<2x32xbf16> to vector<1x2x32xbf16>
    tpu.vector_store %arg4[%30, %c0_10, %c0_11], %33 {strides = array<i32>} : memref<8x2x32xbf16, #tpu.memory_space<vmem>>, vector<1x2x32xbf16>,
    %c1_i32 = arith.constant 1 : i32
    %34 = arith.index_cast %c1_i32 : i32 to index
    %c0_12 = arith.constant 0 : index
    %c0_13 = arith.constant 0 : index
    %35 = vector.load %arg2[%34, %c0_12, %c0_13] : memref<8x2x128xbf16, #tpu.memory_space<vmem>>, vector<1x2x128xbf16>
    %36 = vector.shape_cast %35 : vector<1x2x128xbf16> to vector<2x128xbf16>
    %37 = arith.extf %36 : vector<2x128xbf16> to vector<2x128xf32>
    %38 = arith.truncf %28 : vector<2x32xf32> to vector<2x32xbf16>
    %c0_14 = arith.constant 0 : index
    %c0_15 = arith.constant 0 : index
    %39 = vector.load %arg7[%c0_14, %c0_15] : memref<32x128xbf16, #tpu.memory_space<vmem>>, vector<32x128xbf16>
    %cst_16 = arith.constant dense<0.000000e+00> : vector<2x128xf32>
    %40 = tpu.matmul %38, %39, %cst_16 {dimension_numbers = #tpu.dot_dimension_numbers<[1], [0], [0], [1], [0, 0, 1, 1], [], []>} : vector<2x32xbf16>, vector<32x128xbf16>, vector<2x128xf32> -> vector<2x128xf32>
    %41 = arith.addf %37, %40 : vector<2x128xf32>
    %42 = vector.extract_strided_slice %41 {offsets = [0, 0], sizes = [2, 96], strides = [1, 1]} : vector<2x128xf32> to vector<2x96xf32>
    %43 = arith.negf %42 : vector<2x96xf32>
    %44 = math.exp %43 : vector<2x96xf32>
    %cst_17 = arith.constant 1.000000e+00 : f32
    %45 = vector.broadcast %cst_17 : f32 to vector<2x96xf32>
    %46 = arith.addf %45, %44 : vector<2x96xf32>
    %47 = arith.divf %45, %46 : vector<2x96xf32>
    %48 = vector.extract_strided_slice %47 {offsets = [0, 0], sizes = [2, 32], strides = [1, 1]} : vector<2x96xf32> to vector<2x32xf32>
    %49 = vector.extract_strided_slice %47 {offsets = [0, 32], sizes = [2, 32], strides = [1, 1]} : vector<2x96xf32> to vector<2x32xf32>
    %50 = vector.extract_strided_slice %47 {offsets = [0, 64], sizes = [2, 32], strides = [1, 1]} : vector<2x96xf32> to vector<2x32xf32>
    %51 = vector.extract_strided_slice %41 {offsets = [0, 96], sizes = [2, 32], strides = [1, 1]} : vector<2x128xf32> to vector<2x32xf32>
    %52 = math.tanh %51 : vector<2x32xf32>
    %53 = arith.mulf %49, %26 : vector<2x32xf32>
    %54 = arith.mulf %48, %52 : vector<2x32xf32>
    %55 = arith.addf %53, %54 : vector<2x32xf32>
    %56 = math.tanh %55 : vector<2x32xf32>
    %57 = arith.mulf %50, %56 : vector<2x32xf32>
    %58 = arith.truncf %57 : vector<2x32xf32> to vector<2x32xbf16>
    %59 = arith.index_cast %c1_i32 : i32 to index
    %c0_18 = arith.constant 0 : index
    %c0_19 = arith.constant 0 : index
    %60 = vector.load %arg4[%59, %c0_18, %c0_19] : memref<8x2x32xbf16, #tpu.memory_space<vmem>>, vector<1x2x32xbf16>
    %61 = vector.shape_cast %60 : vector<1x2x32xbf16> to vector<2x32xbf16>
    %62 = vector.shape_cast %58 : vector<2x32xbf16> to vector<1x2x32xbf16>
    tpu.vector_store %arg4[%59, %c0_18, %c0_19], %62 {strides = array<i32>} : memref<8x2x32xbf16, #tpu.memory_space<vmem>>, vector<1x2x32xbf16>,
    %c2_i32 = arith.constant 2 : i32
    %63 = arith.index_cast %c2_i32 : i32 to index
    %c0_20 = arith.constant 0 : index
    %c0_21 = arith.constant 0 : index
    %64 = vector.load %arg2[%63, %c0_20, %c0_21] : memref<8x2x128xbf16, #tpu.memory_space<vmem>>, vector<1x2x128xbf16>
    %65 = vector.shape_cast %64 : vector<1x2x128xbf16> to vector<2x128xbf16>
    %66 = arith.extf %65 : vector<2x128xbf16> to vector<2x128xf32>
    %67 = arith.truncf %57 : vector<2x32xf32> to vector<2x32xbf16>
    %c0_22 = arith.constant 0 : index
    %c0_23 = arith.constant 0 : index
    %68 = vector.load %arg7[%c0_22, %c0_23] : memref<32x128xbf16, #tpu.memory_space<vmem>>, vector<32x128xbf16>
    %cst_24 = arith.constant dense<0.000000e+00> : vector<2x128xf32>
    %69 = tpu.matmul %67, %68, %cst_24 {dimension_numbers = #tpu.dot_dimension_numbers<[1], [0], [0], [1], [0, 0, 1, 1], [], []>} : vector<2x32xbf16>, vector<32x128xbf16>, vector<2x128xf32> -> vector<2x128xf32>
    %70 = arith.addf %66, %69 : vector<2x128xf32>
    %71 = vector.extract_strided_slice %70 {offsets = [0, 0], sizes = [2, 96], strides = [1, 1]} : vector<2x128xf32> to vector<2x96xf32>
    %72 = arith.negf %71 : vector<2x96xf32>
    %73 = math.exp %72 : vector<2x96xf32>
    %cst_25 = arith.constant 1.000000e+00 : f32
    %74 = vector.broadcast %cst_25 : f32 to vector<2x96xf32>
    %75 = arith.addf %74, %73 : vector<2x96xf32>
    %76 = arith.divf %74, %75 : vector<2x96xf32>
    %77 = vector.extract_strided_slice %76 {offsets = [0, 0], sizes = [2, 32], strides = [1, 1]} : vector<2x96xf32> to vector<2x32xf32>
    %78 = vector.extract_strided_slice %76 {offsets = [0, 32], sizes = [2, 32], strides = [1, 1]} : vector<2x96xf32> to vector<2x32xf32>
    %79 = vector.extract_strided_slice %76 {offsets = [0, 64], sizes = [2, 32], strides = [1, 1]} : vector<2x96xf32> to vector<2x32xf32>
    %80 = vector.extract_strided_slice %70 {offsets = [0, 96], sizes = [2, 32], strides = [1, 1]} : vector<2x128xf32> to vector<2x32xf32>
    %81 = math.tanh %80 : vector<2x32xf32>
    %82 = arith.mulf %78, %55 : vector<2x32xf32>
    %83 = arith.mulf %77, %81 : vector<2x32xf32>
    %84 = arith.addf %82, %83 : vector<2x32xf32>
    %85 = math.tanh %84 : vector<2x32xf32>
    %86 = arith.mulf %79, %85 : vector<2x32xf32>
    %87 = arith.truncf %86 : vector<2x32xf32> to vector<2x32xbf16>
    %88 = arith.index_cast %c2_i32 : i32 to index
    %c0_26 = arith.constant 0 : index
    %c0_27 = arith.constant 0 : index
    %89 = vector.load %arg4[%88, %c0_26, %c0_27] : memref<8x2x32xbf16, #tpu.memory_space<vmem>>, vector<1x2x32xbf16>
    %90 = vector.shape_cast %89 : vector<1x2x32xbf16> to vector<2x32xbf16>
    %91 = vector.shape_cast %87 : vector<2x32xbf16> to vector<1x2x32xbf16>
    tpu.vector_store %arg4[%88, %c0_26, %c0_27], %91 {strides = array<i32>} : memref<8x2x32xbf16, #tpu.memory_space<vmem>>, vector<1x2x32xbf16>,
    %c3_i32 = arith.constant 3 : i32
    %92 = arith.index_cast %c3_i32 : i32 to index
    %c0_28 = arith.constant 0 : index
    %c0_29 = arith.constant 0 : index
    %93 = vector.load %arg2[%92, %c0_28, %c0_29] : memref<8x2x128xbf16, #tpu.memory_space<vmem>>, vector<1x2x128xbf16>
    %94 = vector.shape_cast %93 : vector<1x2x128xbf16> to vector<2x128xbf16>
    %95 = arith.extf %94 : vector<2x128xbf16> to vector<2x128xf32>
    %96 = arith.truncf %86 : vector<2x32xf32> to vector<2x32xbf16>
    %c0_30 = arith.constant 0 : index
    %c0_31 = arith.constant 0 : index
    %97 = vector.load %arg7[%c0_30, %c0_31] : memref<32x128xbf16, #tpu.memory_space<vmem>>, vector<32x128xbf16>
    %cst_32 = arith.constant dense<0.000000e+00> : vector<2x128xf32>
    %98 = tpu.matmul %96, %97, %cst_32 {dimension_numbers = #tpu.dot_dimension_numbers<[1], [0], [0], [1], [0, 0, 1, 1], [], []>} : vector<2x32xbf16>, vector<32x128xbf16>, vector<2x128xf32> -> vector<2x128xf32>
    %99 = arith.addf %95, %98 : vector<2x128xf32>
    %100 = vector.extract_strided_slice %99 {offsets = [0, 0], sizes = [2, 96], strides = [1, 1]} : vector<2x128xf32> to vector<2x96xf32>
    %101 = arith.negf %100 : vector<2x96xf32>
    %102 = math.exp %101 : vector<2x96xf32>
    %cst_33 = arith.constant 1.000000e+00 : f32
    %103 = vector.broadcast %cst_33 : f32 to vector<2x96xf32>
    %104 = arith.addf %103, %102 : vector<2x96xf32>
    %105 = arith.divf %103, %104 : vector<2x96xf32>
    %106 = vector.extract_strided_slice %105 {offsets = [0, 0], sizes = [2, 32], strides = [1, 1]} : vector<2x96xf32> to vector<2x32xf32>
    %107 = vector.extract_strided_slice %105 {offsets = [0, 32], sizes = [2, 32], strides = [1, 1]} : vector<2x96xf32> to vector<2x32xf32>
    %108 = vector.extract_strided_slice %105 {offsets = [0, 64], sizes = [2, 32], strides = [1, 1]} : vector<2x96xf32> to vector<2x32xf32>
    %109 = vector.extract_strided_slice %99 {offsets = [0, 96], sizes = [2, 32], strides = [1, 1]} : vector<2x128xf32> to vector<2x32xf32>
    %110 = math.tanh %109 : vector<2x32xf32>
    %111 = arith.mulf %107, %84 : vector<2x32xf32>
    %112 = arith.mulf %106, %110 : vector<2x32xf32>
    %113 = arith.addf %111, %112 : vector<2x32xf32>
    %114 = math.tanh %113 : vector<2x32xf32>
    %115 = arith.mulf %108, %114 : vector<2x32xf32>
    %116 = arith.truncf %115 : vector<2x32xf32> to vector<2x32xbf16>
    %117 = arith.index_cast %c3_i32 : i32 to index
    %c0_34 = arith.constant 0 : index
    %c0_35 = arith.constant 0 : index
    %118 = vector.load %arg4[%117, %c0_34, %c0_35] : memref<8x2x32xbf16, #tpu.memory_space<vmem>>, vector<1x2x32xbf16>
    %119 = vector.shape_cast %118 : vector<1x2x32xbf16> to vector<2x32xbf16>
    %120 = vector.shape_cast %116 : vector<2x32xbf16> to vector<1x2x32xbf16>
    tpu.vector_store %arg4[%117, %c0_34, %c0_35], %120 {strides = array<i32>} : memref<8x2x32xbf16, #tpu.memory_space<vmem>>, vector<1x2x32xbf16>,
    %c4_i32 = arith.constant 4 : i32
    %121 = arith.index_cast %c4_i32 : i32 to index
    %c0_36 = arith.constant 0 : index
    %c0_37 = arith.constant 0 : index
    %122 = vector.load %arg2[%121, %c0_36, %c0_37] : memref<8x2x128xbf16, #tpu.memory_space<vmem>>, vector<1x2x128xbf16>
    %123 = vector.shape_cast %122 : vector<1x2x128xbf16> to vector<2x128xbf16>
    %124 = arith.extf %123 : vector<2x128xbf16> to vector<2x128xf32>
    %125 = arith.truncf %115 : vector<2x32xf32> to vector<2x32xbf16>
    %c0_38 = arith.constant 0 : index
    %c0_39 = arith.constant 0 : index
    %126 = vector.load %arg7[%c0_38, %c0_39] : memref<32x128xbf16, #tpu.memory_space<vmem>>, vector<32x128xbf16>
    %cst_40 = arith.constant dense<0.000000e+00> : vector<2x128xf32>
    %127 = tpu.matmul %125, %126, %cst_40 {dimension_numbers = #tpu.dot_dimension_numbers<[1], [0], [0], [1], [0, 0, 1, 1], [], []>} : vector<2x32xbf16>, vector<32x128xbf16>, vector<2x128xf32> -> vector<2x128xf32>
    %128 = arith.addf %124, %127 : vector<2x128xf32>
    %129 = vector.extract_strided_slice %128 {offsets = [0, 0], sizes = [2, 96], strides = [1, 1]} : vector<2x128xf32> to vector<2x96xf32>
    %130 = arith.negf %129 : vector<2x96xf32>
    %131 = math.exp %130 : vector<2x96xf32>
    %cst_41 = arith.constant 1.000000e+00 : f32
    %132 = vector.broadcast %cst_41 : f32 to vector<2x96xf32>
    %133 = arith.addf %132, %131 : vector<2x96xf32>
    %134 = arith.divf %132, %133 : vector<2x96xf32>
    %135 = vector.extract_strided_slice %134 {offsets = [0, 0], sizes = [2, 32], strides = [1, 1]} : vector<2x96xf32> to vector<2x32xf32>
    %136 = vector.extract_strided_slice %134 {offsets = [0, 32], sizes = [2, 32], strides = [1, 1]} : vector<2x96xf32> to vector<2x32xf32>
    %137 = vector.extract_strided_slice %134 {offsets = [0, 64], sizes = [2, 32], strides = [1, 1]} : vector<2x96xf32> to vector<2x32xf32>
    %138 = vector.extract_strided_slice %128 {offsets = [0, 96], sizes = [2, 32], strides = [1, 1]} : vector<2x128xf32> to vector<2x32xf32>
    %139 = math.tanh %138 : vector<2x32xf32>
    %140 = arith.mulf %136, %113 : vector<2x32xf32>
    %141 = arith.mulf %135, %139 : vector<2x32xf32>
    %142 = arith.addf %140, %141 : vector<2x32xf32>
    %143 = math.tanh %142 : vector<2x32xf32>
    %144 = arith.mulf %137, %143 : vector<2x32xf32>
    %145 = arith.truncf %144 : vector<2x32xf32> to vector<2x32xbf16>
    %146 = arith.index_cast %c4_i32 : i32 to index
    %c0_42 = arith.constant 0 : index
    %c0_43 = arith.constant 0 : index
    %147 = vector.load %arg4[%146, %c0_42, %c0_43] : memref<8x2x32xbf16, #tpu.memory_space<vmem>>, vector<1x2x32xbf16>
    %148 = vector.shape_cast %147 : vector<1x2x32xbf16> to vector<2x32xbf16>
    %149 = vector.shape_cast %145 : vector<2x32xbf16> to vector<1x2x32xbf16>
    tpu.vector_store %arg4[%146, %c0_42, %c0_43], %149 {strides = array<i32>} : memref<8x2x32xbf16, #tpu.memory_space<vmem>>, vector<1x2x32xbf16>,
    %c5_i32 = arith.constant 5 : i32
    %150 = arith.index_cast %c5_i32 : i32 to index
    %c0_44 = arith.constant 0 : index
    %c0_45 = arith.constant 0 : index
    %151 = vector.load %arg2[%150, %c0_44, %c0_45] : memref<8x2x128xbf16, #tpu.memory_space<vmem>>, vector<1x2x128xbf16>
    %152 = vector.shape_cast %151 : vector<1x2x128xbf16> to vector<2x128xbf16>
    %153 = arith.extf %152 : vector<2x128xbf16> to vector<2x128xf32>
    %154 = arith.truncf %144 : vector<2x32xf32> to vector<2x32xbf16>
    %c0_46 = arith.constant 0 : index
    %c0_47 = arith.constant 0 : index
    %155 = vector.load %arg7[%c0_46, %c0_47] : memref<32x128xbf16, #tpu.memory_space<vmem>>, vector<32x128xbf16>
    %cst_48 = arith.constant dense<0.000000e+00> : vector<2x128xf32>
    %156 = tpu.matmul %154, %155, %cst_48 {dimension_numbers = #tpu.dot_dimension_numbers<[1], [0], [0], [1], [0, 0, 1, 1], [], []>} : vector<2x32xbf16>, vector<32x128xbf16>, vector<2x128xf32> -> vector<2x128xf32>
    %157 = arith.addf %153, %156 : vector<2x128xf32>
    %158 = vector.extract_strided_slice %157 {offsets = [0, 0], sizes = [2, 96], strides = [1, 1]} : vector<2x128xf32> to vector<2x96xf32>
    %159 = arith.negf %158 : vector<2x96xf32>
    %160 = math.exp %159 : vector<2x96xf32>
    %cst_49 = arith.constant 1.000000e+00 : f32
    %161 = vector.broadcast %cst_49 : f32 to vector<2x96xf32>
    %162 = arith.addf %161, %160 : vector<2x96xf32>
    %163 = arith.divf %161, %162 : vector<2x96xf32>
    %164 = vector.extract_strided_slice %163 {offsets = [0, 0], sizes = [2, 32], strides = [1, 1]} : vector<2x96xf32> to vector<2x32xf32>
    %165 = vector.extract_strided_slice %163 {offsets = [0, 32], sizes = [2, 32], strides = [1, 1]} : vector<2x96xf32> to vector<2x32xf32>
    %166 = vector.extract_strided_slice %163 {offsets = [0, 64], sizes = [2, 32], strides = [1, 1]} : vector<2x96xf32> to vector<2x32xf32>
    %167 = vector.extract_strided_slice %157 {offsets = [0, 96], sizes = [2, 32], strides = [1, 1]} : vector<2x128xf32> to vector<2x32xf32>
    %168 = math.tanh %167 : vector<2x32xf32>
    %169 = arith.mulf %165, %142 : vector<2x32xf32>
    %170 = arith.mulf %164, %168 : vector<2x32xf32>
    %171 = arith.addf %169, %170 : vector<2x32xf32>
    %172 = math.tanh %171 : vector<2x32xf32>
    %173 = arith.mulf %166, %172 : vector<2x32xf32>
    %174 = arith.truncf %173 : vector<2x32xf32> to vector<2x32xbf16>
    %175 = arith.index_cast %c5_i32 : i32 to index
    %c0_50 = arith.constant 0 : index
    %c0_51 = arith.constant 0 : index
    %176 = vector.load %arg4[%175, %c0_50, %c0_51] : memref<8x2x32xbf16, #tpu.memory_space<vmem>>, vector<1x2x32xbf16>
    %177 = vector.shape_cast %176 : vector<1x2x32xbf16> to vector<2x32xbf16>
    %178 = vector.shape_cast %174 : vector<2x32xbf16> to vector<1x2x32xbf16>
    tpu.vector_store %arg4[%175, %c0_50, %c0_51], %178 {strides = array<i32>} : memref<8x2x32xbf16, #tpu.memory_space<vmem>>, vector<1x2x32xbf16>,
    %c6_i32 = arith.constant 6 : i32
    %179 = arith.index_cast %c6_i32 : i32 to index
    %c0_52 = arith.constant 0 : index
    %c0_53 = arith.constant 0 : index
    %180 = vector.load %arg2[%179, %c0_52, %c0_53] : memref<8x2x128xbf16, #tpu.memory_space<vmem>>, vector<1x2x128xbf16>
    %181 = vector.shape_cast %180 : vector<1x2x128xbf16> to vector<2x128xbf16>
    %182 = arith.extf %181 : vector<2x128xbf16> to vector<2x128xf32>
    %183 = arith.truncf %173 : vector<2x32xf32> to vector<2x32xbf16>
    %c0_54 = arith.constant 0 : index
    %c0_55 = arith.constant 0 : index
    %184 = vector.load %arg7[%c0_54, %c0_55] : memref<32x128xbf16, #tpu.memory_space<vmem>>, vector<32x128xbf16>
    %cst_56 = arith.constant dense<0.000000e+00> : vector<2x128xf32>
    %185 = tpu.matmul %183, %184, %cst_56 {dimension_numbers = #tpu.dot_dimension_numbers<[1], [0], [0], [1], [0, 0, 1, 1], [], []>} : vector<2x32xbf16>, vector<32x128xbf16>, vector<2x128xf32> -> vector<2x128xf32>
    %186 = arith.addf %182, %185 : vector<2x128xf32>
    %187 = vector.extract_strided_slice %186 {offsets = [0, 0], sizes = [2, 96], strides = [1, 1]} : vector<2x128xf32> to vector<2x96xf32>
    %188 = arith.negf %187 : vector<2x96xf32>
    %189 = math.exp %188 : vector<2x96xf32>
    %cst_57 = arith.constant 1.000000e+00 : f32
    %190 = vector.broadcast %cst_57 : f32 to vector<2x96xf32>
    %191 = arith.addf %190, %189 : vector<2x96xf32>
    %192 = arith.divf %190, %191 : vector<2x96xf32>
    %193 = vector.extract_strided_slice %192 {offsets = [0, 0], sizes = [2, 32], strides = [1, 1]} : vector<2x96xf32> to vector<2x32xf32>
    %194 = vector.extract_strided_slice %192 {offsets = [0, 32], sizes = [2, 32], strides = [1, 1]} : vector<2x96xf32> to vector<2x32xf32>
    %195 = vector.extract_strided_slice %192 {offsets = [0, 64], sizes = [2, 32], strides = [1, 1]} : vector<2x96xf32> to vector<2x32xf32>
    %196 = vector.extract_strided_slice %186 {offsets = [0, 96], sizes = [2, 32], strides = [1, 1]} : vector<2x128xf32> to vector<2x32xf32>
    %197 = math.tanh %196 : vector<2x32xf32>
    %198 = arith.mulf %194, %171 : vector<2x32xf32>
    %199 = arith.mulf %193, %197 : vector<2x32xf32>
    %200 = arith.addf %198, %199 : vector<2x32xf32>
    %201 = math.tanh %200 : vector<2x32xf32>
    %202 = arith.mulf %195, %201 : vector<2x32xf32>
    %203 = arith.truncf %202 : vector<2x32xf32> to vector<2x32xbf16>
    %204 = arith.index_cast %c6_i32 : i32 to index
    %c0_58 = arith.constant 0 : index
    %c0_59 = arith.constant 0 : index
    %205 = vector.load %arg4[%204, %c0_58, %c0_59] : memref<8x2x32xbf16, #tpu.memory_space<vmem>>, vector<1x2x32xbf16>
    %206 = vector.shape_cast %205 : vector<1x2x32xbf16> to vector<2x32xbf16>
    %207 = vector.shape_cast %203 : vector<2x32xbf16> to vector<1x2x32xbf16>
    tpu.vector_store %arg4[%204, %c0_58, %c0_59], %207 {strides = array<i32>} : memref<8x2x32xbf16, #tpu.memory_space<vmem>>, vector<1x2x32xbf16>,
    %c7_i32 = arith.constant 7 : i32
    %208 = arith.index_cast %c7_i32 : i32 to index
    %c0_60 = arith.constant 0 : index
    %c0_61 = arith.constant 0 : index
    %209 = vector.load %arg2[%208, %c0_60, %c0_61] : memref<8x2x128xbf16, #tpu.memory_space<vmem>>, vector<1x2x128xbf16>
    %210 = vector.shape_cast %209 : vector<1x2x128xbf16> to vector<2x128xbf16>
    %211 = arith.extf %210 : vector<2x128xbf16> to vector<2x128xf32>
    %212 = arith.truncf %202 : vector<2x32xf32> to vector<2x32xbf16>
    %c0_62 = arith.constant 0 : index
    %c0_63 = arith.constant 0 : index
    %213 = vector.load %arg7[%c0_62, %c0_63] : memref<32x128xbf16, #tpu.memory_space<vmem>>, vector<32x128xbf16>
    %cst_64 = arith.constant dense<0.000000e+00> : vector<2x128xf32>
    %214 = tpu.matmul %212, %213, %cst_64 {dimension_numbers = #tpu.dot_dimension_numbers<[1], [0], [0], [1], [0, 0, 1, 1], [], []>} : vector<2x32xbf16>, vector<32x128xbf16>, vector<2x128xf32> -> vector<2x128xf32>
    %215 = arith.addf %211, %214 : vector<2x128xf32>
    %216 = vector.extract_strided_slice %215 {offsets = [0, 0], sizes = [2, 96], strides = [1, 1]} : vector<2x128xf32> to vector<2x96xf32>
    %217 = arith.negf %216 : vector<2x96xf32>
    %218 = math.exp %217 : vector<2x96xf32>
    %cst_65 = arith.constant 1.000000e+00 : f32
    %219 = vector.broadcast %cst_65 : f32 to vector<2x96xf32>
    %220 = arith.addf %219, %218 : vector<2x96xf32>
    %221 = arith.divf %219, %220 : vector<2x96xf32>
    %222 = vector.extract_strided_slice %221 {offsets = [0, 0], sizes = [2, 32], strides = [1, 1]} : vector<2x96xf32> to vector<2x32xf32>
    %223 = vector.extract_strided_slice %221 {offsets = [0, 32], sizes = [2, 32], strides = [1, 1]} : vector<2x96xf32> to vector<2x32xf32>
    %224 = vector.extract_strided_slice %221 {offsets = [0, 64], sizes = [2, 32], strides = [1, 1]} : vector<2x96xf32> to vector<2x32xf32>
    %225 = vector.extract_strided_slice %215 {offsets = [0, 96], sizes = [2, 32], strides = [1, 1]} : vector<2x128xf32> to vector<2x32xf32>
    %226 = math.tanh %225 : vector<2x32xf32>
    %227 = arith.mulf %223, %200 : vector<2x32xf32>
    %228 = arith.mulf %222, %226 : vector<2x32xf32>
    %229 = arith.addf %227, %228 : vector<2x32xf32>
    %230 = math.tanh %229 : vector<2x32xf32>
    %231 = arith.mulf %224, %230 : vector<2x32xf32>
    %232 = arith.truncf %231 : vector<2x32xf32> to vector<2x32xbf16>
    %233 = arith.index_cast %c7_i32 : i32 to index
    %c0_66 = arith.constant 0 : index
    %c0_67 = arith.constant 0 : index
    %234 = vector.load %arg4[%233, %c0_66, %c0_67] : memref<8x2x32xbf16, #tpu.memory_space<vmem>>, vector<1x2x32xbf16>
    %235 = vector.shape_cast %234 : vector<1x2x32xbf16> to vector<2x32xbf16>
    %236 = vector.shape_cast %232 : vector<2x32xbf16> to vector<1x2x32xbf16>
    tpu.vector_store %arg4[%233, %c0_66, %c0_67], %236 {strides = array<i32>} : memref<8x2x32xbf16, #tpu.memory_space<vmem>>, vector<1x2x32xbf16>,
    %c8_i32 = arith.constant 8 : i32
    %c0_68 = arith.constant 0 : index
    %c0_69 = arith.constant 0 : index
    %237 = vector.load %arg9[%c0_68, %c0_69] : memref<2x32xf32, #tpu.memory_space<vmem>>, vector<2x32xf32>
    tpu.vector_store %arg9[%c0_68, %c0_69], %231 {strides = array<i32>} : memref<2x32xf32, #tpu.memory_space<vmem>>, vector<2x32xf32>,
    %c0_70 = arith.constant 0 : index
    %c0_71 = arith.constant 0 : index
    %238 = vector.load %arg10[%c0_70, %c0_71] : memref<2x32xf32, #tpu.memory_space<vmem>>, vector<2x32xf32>
    tpu.vector_store %arg10[%c0_70, %c0_71], %229 {strides = array<i32>} : memref<2x32xf32, #tpu.memory_space<vmem>>, vector<2x32xf32>,
    %c0_i32_72 = arith.constant 0 : i32
    %239 = arith.cmpi eq, %arg1, %c0_i32_72 : i32
    %240 = arith.extui %239 : i1 to i32
    %c0_i32_73 = arith.constant 0 : i32
    %241 = arith.cmpi ne, %240, %c0_i32_73 : i32
    scf.if %241 {
      %c0_74 = arith.constant 0 : index
      %c0_75 = arith.constant 0 : index
      %242 = vector.load %arg5[%c0_74, %c0_75] : memref<2x32xf32, #tpu.memory_space<vmem>>, vector<2x32xf32>
      tpu.vector_store %arg5[%c0_74, %c0_75], %231 {strides = array<i32>} : memref<2x32xf32, #tpu.memory_space<vmem>>, vector<2x32xf32>,
      %c0_76 = arith.constant 0 : index
      %c0_77 = arith.constant 0 : index
      %243 = vector.load %arg6[%c0_76, %c0_77] : memref<2x32xf32, #tpu.memory_space<vmem>>, vector<2x32xf32>
      tpu.vector_store %arg6[%c0_76, %c0_77], %229 {strides = array<i32>} : memref<2x32xf32, #tpu.memory_space<vmem>>, vector<2x32xf32>,
    } else {
    }
    return
  }
  func.func @transform_0(%arg0: i32, %arg1: i32) -> (i32, i32, i32) {
    %c0_i32 = arith.constant 0 : i32
    %c0_i32_0 = arith.constant 0 : i32
    return %arg1, %arg0, %c0_i32 : i32, i32, i32
  }
  func.func @transform_2(%arg0: i32, %arg1: i32) -> (i32, i32, i32) {
    %c0_i32 = arith.constant 0 : i32
    %c0_i32_0 = arith.constant 0 : i32
    return %arg1, %arg0, %c0_i32 : i32, i32, i32
  }
  func.func @transform_3(%arg0: i32, %arg1: i32) -> (i32, i32) {
    %c0_i32 = arith.constant 0 : i32
    %c0_i32_0 = arith.constant 0 : i32
    return %arg0, %c0_i32 : i32, i32
  }
  func.func @transform_4(%arg0: i32, %arg1: i32) -> (i32, i32) {
    %c0_i32 = arith.constant 0 : i32
    %c0_i32_0 = arith.constant 0 : i32
    return %arg0, %c0_i32 : i32, i32
  }
}

</mosaic_0001>

<bundles_post_ra>
// kernel: rnnlm_forward.13
= control target key start
LH: loop header
LB: loop body
LE: loop exit
PB: predicated region body
PF: predicated region fallthrough
CT: control target
= control target key end

     0   :  { %v158_v1 = vmov 0.0   ;;  %vm159_vm0 = vmmov 0   ;;  %s207_s0 = inlined_call_operand.vmem [shape: bf16[16,32], index: 0, kind: input, shape index: {}]   ;;  %s208_s1 = inlined_call_operand.vmem [shape: bf16[32,40], index: 1, kind: input, shape index: {}]   ;;  %s209_s2 = inlined_call_operand.vmem [shape: f32[1,40], index: 2, kind: input, shape index: {}]   ;;  %s210_s3 = inlined_call_operand.hbm [shape: f32[16,40], index: 3, kind: output, shape index: {}]  }
   0x1   :  { %v131_v0 = vld [vmem:[%s208_s1] sm:$0xff]   ;;  %118 = vmatprep.subr.bf16.mxu0 %v158_v1  ;;  %v132_v2 = vld [vmem:[%s208_s1 + $0x8] sm:$0xff]   ;;  %122 = vmatprep.mubr.msk.bf16.mxu0 %vm159_vm0, %v158_v1 }
   0x2   :  { %119 = vmatpush3.bf16.msra.mxu0 %v131_v0 }
   0x3   :  { %120 = vmatprep.subr.bf16.mxu0 %v158_v1 }
   0x4   :  { %8 = vsyncpa [#allocation3], 0  ;;  %v133_v3 = vld [vmem:[%s207_s0] sm:$0xff]   ;;  %vm46_vm1 = vcmask 261120   ;;  %s160_s20 = smov [#allocation2]   ;;  %vm91_vm2 = vcmask 326656  }
   0x5   :  { %v110_v4 = vld [vmem:[%s209_s2] ss:$0 sm:$0xff]  ;;  %s99_s21 = sshll.u32 %s160_s20, 4  ;;  %s100_s21 = int_to_ptr.vmem [resolvable:$true] %s99_s21 }
   0x6   :  { %121 = vmatpush3.bf16.msra.mxu0 %v132_v2  ;;  %s134_s0 = scalar_lea.vmem %s100_s21, 256  ;;  %p139_p1 = scmp.lt.s32.totalorder %s100_s21, %s100_s21 }
   0x7   :  { %p135_p0 = scmp.ne.s32.totalorder %s100_s21, %s134_s0  ;;  %p140_p2 = scmp.lt.s32.totalorder %s134_s0, %s134_s0 }
   0x9   :  { %123 = vmatmul.mubr.msk.bf16.vlgmr.msra.gmra.mrb[0].mxu0 %vm46_vm1, %v133_v3  ;;  %p141_p3 = por %p140_p2, %p139_p1 }
   0xb   :  { %p142_p4 = pnand %p141_p3, %p135_p0 }
  0xdc   :  { %v84_v5 = vpop.f32.mrb[0].mxu0 }
  0xdd   :  { %v85_v6 = vadd.f32 %v110_v4, %v84_v5  ;;  %v124_v7 = vpop.f32.mrb[1].mxu0 }
  0xde   :  { %v87_v8 = vpop.f32.mrb[2].mxu0 }
  0xdf   :  { %92 = vst.msk [vmem:[#allocation2] sm:$0xff] %vm91_vm2, %v85_v6  ;;  %v88_v9 = vadd.f32 %v110_v4, %v87_v8  ;;  %v125_v10 = vpop.f32.mrb[3].mxu0 }
  0xe1   :  { %93 = vst.msk [vmem:[#allocation2 + $0x8] sm:$0xff] %vm91_vm2, %v88_v9 }
  0xe2   :  { %145 = shalt.err (!%p142_p4)
}
  0xe3   :  { %s146_s22 = scalar_lea.hbm %s210_s3, 256 }
  0xe4   :  { %p147_p5 = scmp.ne.s32.totalorder %s210_s3, %s146_s22  ;;  %p150_p6 = scmp.lt.u32.totalorder %s146_s22, %s210_s3 }
  0xe6   :  { %p152_p7 = pnand %p150_p6, %p147_p5 }
  0xe8   :  { %155 = shalt.err (!%p152_p7)
}
  0xe9   :  { %s161_s27 = smov 128   ;;  %s162_s28 = smov 8  }
  0xea   :  { %105 = dma.vmem_to_hbm [thread:$0]  %s100_s21, 256, %s210_s3, [#allocation3], %s161_s27, %s161_s27, %s162_s28  }
  0xeb   :  { %156 = dma.done.wait [#allocation3], 256  }
  0xec   :  { %157 = vsyncadd [#allocation3], 4294967040 }
  0xed   :  { %109 = vsyncpa [#allocation3], 1 }

// kernel: rnnlm_forward.9
= control target key start
LH: loop header
LB: loop body
LE: loop exit
PB: predicated region body
PF: predicated region fallthrough
CT: control target
= control target key end

     0   :  { %v134_v0 = vmov 0.0   ;;  %vm135_vm0 = vmmov 0   ;;  %vm45_vm1 = vcmask 261120   ;;  %s171_s1 = inlined_call_operand.vmem [shape: bf16[32,128], index: 1, kind: input, shape index: {}]   ;;  %s172_s0 = inlined_call_operand.vmem [shape: bf16[16,32], index: 0, kind: input, shape index: {}]   ;;  %s173_s2 = inlined_call_operand.vmem [shape: f32[1,128], index: 2, kind: input, shape index: {}]   ;;  %s174_s3 = inlined_call_operand.vmem [shape: bf16[16,128], index: 3, kind: output, shape index: {}]  }
   0x1   :  { %121 = vmatprep.subr.bf16.mxu0 %v134_v0  ;;  %v131_v1 = vld [vmem:[%s171_s1] sm:$0xff]   ;;  %125 = vmatprep.mubr.msk.bf16.mxu0 %vm135_vm0, %v134_v0  ;;  %v132_v2 = vld [vmem:[%s171_s1 + $0x8] sm:$0xff]  }
   0x2   :  { %122 = vmatpush3.bf16.msra.mxu0 %v131_v1  ;;  %v133_v3 = vld [vmem:[%s172_s0] sm:$0xff]  }
   0x3   :  { %123 = vmatprep.subr.bf16.mxu0 %v134_v0  ;;  %v104_v4 = vld [vmem:[%s173_s2] ss:$0 sm:$0xff] }
   0x6   :  { %124 = vmatpush3.bf16.msra.mxu0 %v132_v2 }
   0x9   :  { %126 = vmatmul.mubr.msk.bf16.vlgmr.msra.gmra.mrb[0].mxu0 %vm45_vm1, %v133_v3 }
  0xdc   :  { %v83_v5 = vpop.f32.mrb[0].mxu0 }
  0xdd   :  { %v127_v6 = vpop.f32.mrb[1].mxu0  ;;  %v84_v8 = vadd.f32 %v104_v4, %v83_v5 }
  0xde   :  { %v86_v7 = vpop.f32.mrb[2].mxu0 }
  0xdf   :  { %v87_v9 = vadd.f32 %v104_v4, %v86_v7  ;;  %v128_v10 = vpop.f32.mrb[3].mxu0 }
  0xe1   :  { %v116_v11 = vpack.c.bf16 %v87_v9, %v84_v8 }
  0xe3   :  { %117 = vst [vmem:[%s174_s3] sm:$0xff] %v116_v11  }

// kernel: rnnlm_forward.7
= control target key start
LH: loop header
LB: loop body
LE: loop exit
PB: predicated region body
PF: predicated region fallthrough
CT: control target
= control target key end

     0   :  { %v115_v0 = vmov 0.0   ;;  %vm116_vm0 = vmmov 0   ;;  %vm33_vm1 = vcmask 130048   ;;  %s152_s1 = inlined_call_operand.vmem [shape: bf16[16,128], index: 1, kind: input, shape index: {}]   ;;  %s153_s0 = inlined_call_operand.vmem [shape: f32[16,16], index: 0, kind: input, shape index: {}]   ;;  %s154_s2 = inlined_call_operand.vmem [shape: f32[1,128], index: 2, kind: input, shape index: {}]   ;;  %s155_s3 = inlined_call_operand.vmem [shape: bf16[16,128], index: 3, kind: output, shape index: {}]  }
   0x1   :  { %106 = vmatprep.subr.bf16.mxu0 %v115_v0  ;;  %v114_v1 = vld [vmem:[%s152_s1] sm:$0xff]   ;;  %108 = vmatprep.mubr.msk.bf16.mxu0 %vm116_vm0, %v115_v0  ;;  %v16_v3 = vld [vmem:[%s153_s0 + $0x8] sm:$0xff] }
   0x2   :  { %v15_v2 = vld [vmem:[%s153_s0] sm:$0xff]  ;;  %107 = vmatpush3.bf16.msra.mxu0 %v114_v1 }
   0x3   :  { %v17_v4 = vpack.c.bf16 %v16_v3, %v15_v2  ;;  %v92_v5 = vld [vmem:[%s154_s2] ss:$0 sm:$0xff] }
   0x5   :  { %109 = vmatmul.mubr.msk.bf16.vlgmr.msra.gmra.mrb[0].mxu0 %vm33_vm1, %v17_v4 }
  0xd8   :  { %v71_v6 = vpop.f32.mrb[0].mxu0 }
  0xd9   :  { %v110_v7 = vpop.f32.mrb[1].mxu0  ;;  %v72_v9 = vadd.f32 %v92_v5, %v71_v6 }
  0xda   :  { %v74_v8 = vpop.f32.mrb[2].mxu0 }
  0xdb   :  { %v75_v10 = vadd.f32 %v92_v5, %v74_v8  ;;  %v111_v11 = vpop.f32.mrb[3].mxu0 }
  0xdd   :  { %v102_v12 = vpack.c.bf16 %v75_v10, %v72_v9 }
  0xdf   :  { %103 = vst [vmem:[%s155_s3] sm:$0xff] %v102_v12  }

// kernel: rnnlm_forward.8
= control target key start
LH: loop header
LB: loop body
LE: loop exit
PB: predicated region body
PF: predicated region fallthrough
CT: control target
= control target key end

     0   :  { %s1330_s0 = inlined_call_operand.vmem [shape: bf16[8,2,128], index: 0, kind: input, shape index: {}]   ;;  %s1331_s1 = inlined_call_operand.vmem [shape: bf16[32,128], index: 1, kind: input, shape index: {}]   ;;  %s1332_s2 = inlined_call_operand.vmem [shape: bf16[8,2,32], index: 2, kind: output, shape index: {0}]   ;;  %s1333_s3 = inlined_call_operand.vmem [shape: f32[2,32], index: 3, kind: output, shape index: {1}]   ;;  %s1334_s4 = inlined_call_operand.vmem [shape: f32[2,32], index: 4, kind: output, shape index: {2}]  }
   0x1   :  { %v1132_v0 = vld [vmem:[%s1331_s1] sm:$0xff]  ;;  %v1137_v1 = vld [vmem:[%s1331_s1 + $0x8] sm:$0xff] }
   0x2   :  { %60 = vsyncadd [#allocation3], 256  ;;  %vm61_vm0 = vcmask 254976   ;;  %v1097_v2 = vmov 0.0  }
   0x3   :  { %62 = vst.msk [vmem:[#allocation4] sm:$0x3] %vm61_vm0, %v1097_v2  ;;  %63 = vst.msk [vmem:[#allocation5] sm:$0x3] %vm61_vm0, %v1097_v2 }
   0x4   :  { %1095 = dma.done.wait [#allocation3], 256 }
   0x5   :  { %1096 = vsyncadd [#allocation3], 4294967040  ;;  %960 = vmatprep.subr.bf16.mxu0 %v1097_v2  ;;  %968 = vmatprep.subr.bf16.mxu1 %v1097_v2  ;;  %vm1098_vm1 = vmmov 0   ;;  %vm75_vm2 = vcmask 261120   ;;  %v70_v5 = vld [vmem:[%s1330_s0] sm:$0x1] }
   0x6   :  { %961 = vmatpush3.bf16.msra.mxu0 %v1132_v0  ;;  %964 = vmatprep.mubr.msk.bf16.mxu0 %vm1098_vm1, %v1097_v2  ;;  %v71_v6 = vunpack.c.l.bf16 %v70_v5  ;;  %s1099_s20 = smov 32   ;;  %s1100_s21 = smov 64   ;;  %v907_v29 = vld [vmem:[%s1330_s0 + $0x1] sm:$0x1]  ;;  %v911_v51 = vld [vmem:[%s1330_s0 + $0x2] sm:$0x1] }
   0x7   :  { %962 = vmatprep.subr.bf16.mxu0 %v1097_v2  ;;  %969 = vmatpush3.bf16.msra.mxu1 %v1132_v0  ;;  %v178_v30 = vunpack.c.l.bf16 %v907_v29  ;;  %v274_v52 = vunpack.c.l.bf16 %v911_v51  ;;  %vm174_vm3 = vcmask 253952   ;;  %s1103_s23 = smov 96  }
   0x8   :  { %970 = vmatprep.subr.bf16.mxu1 %v1097_v2  ;;  %972 = vmatprep.mubr.msk.bf16.mxu1 %vm1098_vm1, %v1097_v2 }
   0xa   :  { %963 = vmatpush3.bf16.msra.mxu0 %v1137_v1  ;;  %v68_v3 = vld [vmem:[#allocation4] sm:$0x3]  ;;  %v906_v13 = vld.sshfl [vmem:[#allocation5] sm:$0x3 pattern:$0x76325410] }
   0xb   :  { %971 = vmatpush3.bf16.msra.mxu1 %v1137_v1  ;;  %976 = vmatprep.subr.bf16.mxu0 %v1097_v2  ;;  %v72_v4 = vpack.c.bf16 %v68_v3, %v68_v3 }
   0xc   :  { %984 = vmatprep.subr.bf16.mxu1 %v1097_v2 }
   0xd   :  { %965 = vmatmul.mubr.msk.bf16.vlgmr.msra.gmra.mrb[0].mxu0 %vm75_vm2, %v72_v4 }
   0xe   :  { %977 = vmatpush3.bf16.msra.mxu0 %v1132_v0  ;;  %980 = vmatprep.mubr.msk.bf16.mxu0 %vm1098_vm1, %v1097_v2 }
   0xf   :  { %978 = vmatprep.subr.bf16.mxu0 %v1097_v2 }
  0x12   :  { %979 = vmatpush3.bf16.msra.mxu0 %v1137_v1 }
  0x13   :  { %992 = vmatprep.subr.bf16.mxu0 %v1097_v2 }
  0xe0   :  { %v113_v7 = vpop.f32.mrb[0].mxu0 }
  0xe1   :  { %v119_v8 = vadd.f32 %v113_v7, %v71_v6  ;;  %v966_v9 = vpop.f32.mrb[1].mxu0 }
  0xe2   :  { %v116_v10 = vpop.f32.mrb[2].mxu0 }
  0xe3   :  { %1031 = vtanh.f32 %v119_v8  ;;  %v967_v11 = vpop.f32.mrb[3].mxu0  ;;  %v905_v14 = vmul.f32 -1.442695, %v119_v8 }
  0xe5   :  { %1033 = vpow2.f32 %v905_v14 }
  0xed   :  { %v1032_v12 = vpop.eup %1031 }
  0xee   :  { %140 = vrot.lane.b32.xlu0 %v1032_v12, %s1099_s20  ;;  %v915_v12 = vld [vmem:[%s1330_s0 + $0x3] sm:$0x1] }
  0xef   :  { %v1034_v15 = vpop.eup %1033 }
  0xf0   :  { %v123_v16 = vadd.f32 1.0, %v1034_v15 }
  0xf2   :  { %135 = vrot.lane.b32.xlu0 %v906_v13, %s1099_s20  ;;  %1035 = vrcp.f32 %v123_v16  ;;  %v370_v13 = vunpack.c.l.bf16 %v915_v12 }
  0xfc   :  { %v1036_v17 = vpop.eup %1035 }
 0x160   :  { %v141_v18 = vpop.permute.xlu0 %140 }
 0x161   :  { %v143_v19 = vmul.f32 %v1036_v17, %v141_v18 }
 0x163   :  { %145 = vrot.lane.b32.xlu1 %v143_v19, %s1099_s20 }
 0x164   :  { %v136_v20 = vpop.permute.xlu0 %135 }
 0x165   :  { %v138_v21 = vmul.f32 %v1036_v17, %v136_v20 }
 0x1d5   :  { %v146_v22 = vpop.permute.xlu1 %145 }
 0x1d6   :  { %v148_v23 = vadd.f32 %v146_v22, %v138_v21 }
 0x1d8   :  { %1037 = vtanh.f32 %v148_v23 }
 0x1e2   :  { %v1038_v24 = vpop.eup %1037 }
 0x1e3   :  { %151 = vrot.lane.b32.xlu1 %v1038_v24, %s1099_s20 }
 0x255   :  { %v152_v25 = vpop.permute.xlu1 %151 }
 0x256   :  { %v154_v26 = vmul.f32 %v1036_v17, %v152_v25 }
 0x258   :  { %v1171_v27 = vpack.c.bf16 %v154_v26, %v154_v26 }
 0x25a   :  { %181 = vrot.lane.b32.xlu0 %v1171_v27, %s1100_s21 }
 0x2cc   :  { %v182_v28 = vpop.permute.xlu0 %181 }
 0x2cd   :  { %973 = vmatmul.mubr.msk.bf16.vlgmr.msra.gmra.mrb[0].mxu1 %vm75_vm2, %v182_v28 }
 0x2ce   :  { %985 = vmatpush3.bf16.msra.mxu1 %v1132_v0  ;;  %988 = vmatprep.mubr.msk.bf16.mxu1 %vm1098_vm1, %v1097_v2 }
 0x2cf   :  { %986 = vmatprep.subr.bf16.mxu1 %v1097_v2 }
 0x2d2   :  { %987 = vmatpush3.bf16.msra.mxu1 %v1137_v1 }
 0x2d3   :  { %1000 = vmatprep.subr.bf16.mxu1 %v1097_v2 }
 0x3a0   :  { %v220_v31 = vpop.f32.mrb[0].mxu1 }
 0x3a1   :  { %v226_v32 = vadd.f32 %v220_v31, %v178_v30  ;;  %v974_v33 = vpop.f32.mrb[1].mxu1 }
 0x3a2   :  { %v223_v34 = vpop.f32.mrb[2].mxu1 }
 0x3a3   :  { %1039 = vtanh.f32 %v226_v32  ;;  %v975_v35 = vpop.f32.mrb[3].mxu1  ;;  %v909_v37 = vmul.f32 -1.442695, %v226_v32 }
 0x3a4   :  { %v919_v35 = vld [vmem:[%s1330_s0 + $0x4] sm:$0x1] }
 0x3a5   :  { %1041 = vpow2.f32 %v909_v37 }
 0x3ad   :  { %v1040_v36 = vpop.eup %1039 }
 0x3ae   :  { %236 = vrot.lane.b32.xlu1 %v1040_v36, %s1099_s20  ;;  %v466_v36 = vunpack.c.l.bf16 %v919_v35 }
 0x3af   :  { %v1042_v38 = vpop.eup %1041 }
 0x3b0   :  { %v230_v39 = vadd.f32 1.0, %v1042_v38 }
 0x3b2   :  { %1043 = vrcp.f32 %v230_v39 }
 0x3bc   :  { %v1044_v40 = vpop.eup %1043 }
 0x3bd   :  { %v234_v43 = vmul.f32 %v1044_v40, %v148_v23 }
 0x420   :  { %v237_v41 = vpop.permute.xlu1 %236 }
 0x421   :  { %v239_v42 = vmul.f32 %v1044_v40, %v237_v41 }
 0x423   :  { %241 = vrot.lane.b32.xlu0 %v239_v42, %s1099_s20 }
 0x495   :  { %v242_v44 = vpop.permute.xlu0 %241 }
 0x496   :  { %v244_v45 = vadd.f32 %v242_v44, %v234_v43 }
 0x498   :  { %1045 = vtanh.f32 %v244_v45 }
 0x4a2   :  { %v1046_v46 = vpop.eup %1045 }
 0x4a3   :  { %247 = vrot.lane.b32.xlu1 %v1046_v46, %s1099_s20 }
 0x515   :  { %v248_v47 = vpop.permute.xlu1 %247 }
 0x516   :  { %v250_v48 = vmul.f32 %v1044_v40, %v248_v47 }
 0x518   :  { %v1188_v49 = vpack.c.bf16 %v250_v48, %v250_v48 }
 0x51a   :  { %277 = vrot.lane.b32.xlu0 %v1188_v49, %s1100_s21 }
 0x58c   :  { %v278_v50 = vpop.permute.xlu0 %277 }
 0x58d   :  { %981 = vmatmul.mubr.msk.bf16.vlgmr.msra.gmra.mrb[4].mxu0 %vm75_vm2, %v278_v50 }
 0x58e   :  { %993 = vmatpush3.bf16.msra.mxu0 %v1132_v0  ;;  %996 = vmatprep.mubr.msk.bf16.mxu0 %vm1098_vm1, %v1097_v2 }
 0x58f   :  { %994 = vmatprep.subr.bf16.mxu0 %v1097_v2 }
 0x592   :  { %995 = vmatpush3.bf16.msra.mxu0 %v1137_v1 }
 0x593   :  { %1008 = vmatprep.subr.bf16.mxu0 %v1097_v2 }
 0x660   :  { %v316_v53 = vpop.f32.mrb[4].mxu0 }
 0x661   :  { %v322_v54 = vadd.f32 %v316_v53, %v274_v52  ;;  %v982_v55 = vpop.f32.mrb[5].mxu0 }
 0x662   :  { %v319_v56 = vpop.f32.mrb[6].mxu0 }
 0x663   :  { %1047 = vtanh.f32 %v322_v54  ;;  %v983_v57 = vpop.f32.mrb[7].mxu0  ;;  %v913_v59 = vmul.f32 -1.442695, %v322_v54 }
 0x665   :  { %1049 = vpow2.f32 %v913_v59 }
 0x66d   :  { %v1048_v58 = vpop.eup %1047 }
 0x66e   :  { %332 = vrot.lane.b32.xlu1 %v1048_v58, %s1099_s20  ;;  %v923_v58 = vld [vmem:[%s1330_s0 + $0x5] sm:$0x1] }
 0x66f   :  { %v1050_v60 = vpop.eup %1049  ;;  %v562_v59 = vunpack.c.l.bf16 %v923_v58 }
 0x670   :  { %v326_v61 = vadd.f32 1.0, %v1050_v60 }
 0x672   :  { %1051 = vrcp.f32 %v326_v61 }
 0x67c   :  { %v1052_v62 = vpop.eup %1051 }
 0x67d   :  { %v330_v4 = vmul.f32 %v1052_v62, %v244_v45 }
 0x6e0   :  { %v333_v63 = vpop.permute.xlu1 %332 }
 0x6e1   :  { %v335_v3 = vmul.f32 %v1052_v62, %v333_v63 }
 0x6e3   :  { %337 = vrot.lane.b32.xlu0 %v335_v3, %s1099_s20 }
 0x755   :  { %v338_v5 = vpop.permute.xlu0 %337 }
 0x756   :  { %v340_v6 = vadd.f32 %v338_v5, %v330_v4 }
 0x758   :  { %1053 = vtanh.f32 %v340_v6 }
 0x762   :  { %v1054_v7 = vpop.eup %1053 }
 0x763   :  { %343 = vrot.lane.b32.xlu1 %v1054_v7, %s1099_s20 }
 0x7d5   :  { %v344_v8 = vpop.permute.xlu1 %343 }
 0x7d6   :  { %v346_v9 = vmul.f32 %v1052_v62, %v344_v8 }
 0x7d8   :  { %v1205_v10 = vpack.c.bf16 %v346_v9, %v346_v9 }
 0x7da   :  { %373 = vrot.lane.b32.xlu0 %v1205_v10, %s1100_s21 }
 0x84c   :  { %v374_v11 = vpop.permute.xlu0 %373 }
 0x84d   :  { %989 = vmatmul.mubr.msk.bf16.vlgmr.msra.gmra.mrb[4].mxu1 %vm75_vm2, %v374_v11 }
 0x84e   :  { %1001 = vmatpush3.bf16.msra.mxu1 %v1132_v0  ;;  %1004 = vmatprep.mubr.msk.bf16.mxu1 %vm1098_vm1, %v1097_v2 }
 0x84f   :  { %1002 = vmatprep.subr.bf16.mxu1 %v1097_v2 }
 0x852   :  { %1003 = vmatpush3.bf16.msra.mxu1 %v1137_v1 }
 0x853   :  { %1016 = vmatprep.subr.bf16.mxu1 %v1097_v2 }
 0x920   :  { %v412_v14 = vpop.f32.mrb[4].mxu1 }
 0x921   :  { %v418_v15 = vadd.f32 %v412_v14, %v370_v13  ;;  %v990_v16 = vpop.f32.mrb[5].mxu1 }
 0x922   :  { %v415_v17 = vpop.f32.mrb[6].mxu1 }
 0x923   :  { %1055 = vtanh.f32 %v418_v15  ;;  %v991_v18 = vpop.f32.mrb[7].mxu1  ;;  %v917_v20 = vmul.f32 -1.442695, %v418_v15  ;;  %v927_v17 = vld [vmem:[%s1330_s0 + $0x6] sm:$0x1] }
 0x924   :  { %v658_v18 = vunpack.c.l.bf16 %v927_v17 }
 0x925   :  { %1057 = vpow2.f32 %v917_v20 }
 0x92d   :  { %v1056_v19 = vpop.eup %1055 }
 0x92e   :  { %428 = vrot.lane.b32.xlu1 %v1056_v19, %s1099_s20 }
 0x92f   :  { %v1058_v21 = vpop.eup %1057 }
 0x930   :  { %v422_v22 = vadd.f32 1.0, %v1058_v21 }
 0x932   :  { %1059 = vrcp.f32 %v422_v22 }
 0x93c   :  { %v1060_v23 = vpop.eup %1059 }
 0x93d   :  { %v426_v26 = vmul.f32 %v1060_v23, %v340_v6 }
 0x9a0   :  { %v429_v24 = vpop.permute.xlu1 %428 }
 0x9a1   :  { %v431_v25 = vmul.f32 %v1060_v23, %v429_v24 }
 0x9a3   :  { %433 = vrot.lane.b32.xlu0 %v431_v25, %s1099_s20 }
 0xa15   :  { %v434_v28 = vpop.permute.xlu0 %433 }
 0xa16   :  { %v436_v29 = vadd.f32 %v434_v28, %v426_v26 }
 0xa18   :  { %1061 = vtanh.f32 %v436_v29 }
 0xa22   :  { %v1062_v30 = vpop.eup %1061 }
 0xa23   :  { %439 = vrot.lane.b32.xlu1 %v1062_v30, %s1099_s20 }
 0xa95   :  { %v440_v31 = vpop.permute.xlu1 %439 }
 0xa96   :  { %v442_v32 = vmul.f32 %v1060_v23, %v440_v31 }
 0xa98   :  { %v1222_v33 = vpack.c.bf16 %v442_v32, %v442_v32 }
 0xa9a   :  { %469 = vrot.lane.b32.xlu0 %v1222_v33, %s1100_s21 }
 0xb0c   :  { %v470_v34 = vpop.permute.xlu0 %469 }
 0xb0d   :  { %997 = vmatmul.mubr.msk.bf16.vlgmr.msra.gmra.mrb[8].mxu0 %vm75_vm2, %v470_v34 }
 0xb0e   :  { %1009 = vmatpush3.bf16.msra.mxu0 %v1132_v0  ;;  %1012 = vmatprep.mubr.msk.bf16.mxu0 %vm1098_vm1, %v1097_v2 }
 0xb0f   :  { %1010 = vmatprep.subr.bf16.mxu0 %v1097_v2 }
 0xb12   :  { %1011 = vmatpush3.bf16.msra.mxu0 %v1137_v1 }
 0xbe0   :  { %v508_v37 = vpop.f32.mrb[8].mxu0 }
 0xbe1   :  { %v514_v38 = vadd.f32 %v508_v37, %v466_v36  ;;  %v998_v39 = vpop.f32.mrb[9].mxu0 }
 0xbe2   :  { %v511_v40 = vpop.f32.mrb[10].mxu0 }
 0xbe3   :  { %1063 = vtanh.f32 %v514_v38  ;;  %v999_v41 = vpop.f32.mrb[11].mxu0  ;;  %v921_v43 = vmul.f32 -1.442695, %v514_v38 }
 0xbe4   :  { %v931_v41 = vld [vmem:[%s1330_s0 + $0x7] sm:$0x1] }
 0xbe5   :  { %1065 = vpow2.f32 %v921_v43 }
 0xbed   :  { %v1064_v42 = vpop.eup %1063 }
 0xbee   :  { %524 = vrot.lane.b32.xlu1 %v1064_v42, %s1099_s20  ;;  %v754_v42 = vunpack.c.l.bf16 %v931_v41 }
 0xbef   :  { %v1066_v44 = vpop.eup %1065 }
 0xbf0   :  { %v518_v45 = vadd.f32 1.0, %v1066_v44 }
 0xbf2   :  { %1067 = vrcp.f32 %v518_v45 }
 0xbfc   :  { %v1068_v46 = vpop.eup %1067 }
 0xbfd   :  { %v522_v50 = vmul.f32 %v1068_v46, %v436_v29 }
 0xc60   :  { %v525_v47 = vpop.permute.xlu1 %524 }
 0xc61   :  { %v527_v48 = vmul.f32 %v1068_v46, %v525_v47 }
 0xc63   :  { %529 = vrot.lane.b32.xlu0 %v527_v48, %s1099_s20 }
 0xcd5   :  { %v530_v51 = vpop.permute.xlu0 %529 }
 0xcd6   :  { %v532_v52 = vadd.f32 %v530_v51, %v522_v50 }
 0xcd8   :  { %1069 = vtanh.f32 %v532_v52 }
 0xce2   :  { %v1070_v53 = vpop.eup %1069 }
 0xce3   :  { %535 = vrot.lane.b32.xlu1 %v1070_v53, %s1099_s20  ;;  %v1101_v53 = vmov 1966171168  }
 0xd55   :  { %v536_v54 = vpop.permute.xlu1 %535 }
 0xd56   :  { %v538_v55 = vmul.f32 %v1068_v46, %v536_v54  ;;  %v158_v54 = vunpack.c.l.s4 %v1101_v53 }
 0xd58   :  { %v1238_v56 = vpack.c.bf16 %v538_v55, %v538_v55  ;;  %v160_v55 = vlaneseq }
 0xd5a   :  { %565 = vrot.lane.b32.xlu0 %v1238_v56, %s1100_s21  ;;  %v161_v58 = vshrl.u32 %v160_v55, 7 }
 0xdcc   :  { %v566_v57 = vpop.permute.xlu0 %565 }
 0xdcd   :  { %1005 = vmatmul.mubr.msk.bf16.vlgmr.msra.gmra.mrb[8].mxu1 %vm75_vm2, %v566_v57  ;;  %v159_v57 = vunpack.c.0.s8 %v158_v54 }
 0xdce   :  { %1017 = vmatpush3.bf16.msra.mxu1 %v1132_v0  ;;  %1020 = vmatprep.mubr.msk.bf16.mxu1 %vm1098_vm1, %v1097_v2 }
 0xdcf   :  { %1018 = vmatprep.subr.bf16.mxu1 %v1097_v2 }
 0xdd2   :  { %1019 = vmatpush3.bf16.msra.mxu1 %v1137_v1 }
 0xea0   :  { %v604_v60 = vpop.f32.mrb[8].mxu1 }
 0xea1   :  { %v610_v61 = vadd.f32 %v604_v60, %v562_v59  ;;  %v1006_v62 = vpop.f32.mrb[9].mxu1  ;;  %v162_v59 = vsub.s32 %v159_v57, %v161_v58 }
 0xea2   :  { %v607_v63 = vpop.f32.mrb[10].mxu1 }
 0xea3   :  { %1071 = vtanh.f32 %v610_v61  ;;  %v1007_v3 = vpop.f32.mrb[11].mxu1  ;;  %v925_v0 = vmul.f32 -1.442695, %v610_v61  ;;  %v163_v62 = vrot.slane %v1171_v27, %v162_v59 }
 0xea4   :  { %v355_v3 = vrot.slane %v1205_v10, %v162_v59 }
 0xea5   :  { %1073 = vpow2.f32 %v925_v0  ;;  %v547_v0 = vrot.slane %v1238_v56, %v162_v59 }
 0xead   :  { %v1072_v4 = vpop.eup %1071 }
 0xeae   :  { %620 = vrot.lane.b32.xlu1 %v1072_v4, %s1099_s20  ;;  %v170_v4 = vrot.slane %v163_v62, %v162_v59 }
 0xeaf   :  { %v1074_v5 = vpop.eup %1073 }
 0xeb0   :  { %v614_v2 = vadd.f32 1.0, %v1074_v5  ;;  %v362_v5 = vrot.slane %v355_v3, %v162_v59 }
 0xeb2   :  { %1075 = vrcp.f32 %v614_v2 }
 0xebc   :  { %v1076_v1 = vpop.eup %1075 }
 0xebd   :  { %v618_v8 = vmul.f32 %v1076_v1, %v532_v52 }
 0xf20   :  { %v621_v6 = vpop.permute.xlu1 %620 }
 0xf21   :  { %v623_v7 = vmul.f32 %v1076_v1, %v621_v6 }
 0xf23   :  { %625 = vrot.lane.b32.xlu0 %v623_v7, %s1099_s20 }
 0xf95   :  { %v626_v9 = vpop.permute.xlu0 %625 }
 0xf96   :  { %v628_v11 = vadd.f32 %v626_v9, %v618_v8  ;;  %v259_v9 = vrot.slane %v1188_v49, %v162_v59 }
 0xf98   :  { %1077 = vtanh.f32 %v628_v11 }
 0xfa2   :  { %v1078_v12 = vpop.eup %1077 }
 0xfa3   :  { %631 = vrot.lane.b32.xlu1 %v1078_v12, %s1099_s20 }
0x1015   :  { %v632_v13 = vpop.permute.xlu1 %631 }
0x1016   :  { %v634_v14 = vmul.f32 %v1076_v1, %v632_v13  ;;  %v554_v1 = vrot.slane %v547_v0, %v162_v59  ;;  %v451_v13 = vrot.slane %v1222_v33, %v162_v59 }
0x1018   :  { %v1254_v15 = vpack.c.bf16 %v634_v14, %v634_v14  ;;  %v458_v17 = vrot.slane %v451_v13, %v162_v59 }
0x101a   :  { %661 = vrot.lane.b32.xlu0 %v1254_v15, %s1100_s21  ;;  %v643_v49 = vrot.slane %v1254_v15, %v162_v59 }
0x108c   :  { %v662_v16 = vpop.permute.xlu0 %661 }
0x108d   :  { %1013 = vmatmul.mubr.msk.bf16.vlgmr.msra.gmra.mrb[12].mxu0 %vm75_vm2, %v662_v16  ;;  %v266_v16 = vrot.slane %v259_v9, %v162_v59 }
0x1160   :  { %v700_v19 = vpop.f32.mrb[12].mxu0 }
0x1161   :  { %v706_v20 = vadd.f32 %v700_v19, %v658_v18  ;;  %v1014_v21 = vpop.f32.mrb[13].mxu0  ;;  %v650_v18 = vrot.slane %v643_v49, %v162_v59  ;;  %v1102_v19 = vmov 1983009808  }
0x1162   :  { %v703_v22 = vpop.f32.mrb[14].mxu0 }
0x1163   :  { %1079 = vtanh.f32 %v706_v20  ;;  %v1015_v23 = vpop.f32.mrb[15].mxu0  ;;  %v929_v25 = vmul.f32 -1.442695, %v706_v20  ;;  %v850_v20 = vunpack.c.l.s4 %v1102_v19 }
0x1165   :  { %1081 = vpow2.f32 %v929_v25  ;;  %v851_v33 = vunpack.c.0.s8 %v850_v20 }
0x1167   :  { %v854_v22 = vsub.s32 %v851_v33, %v161_v58 }
0x116d   :  { %v1080_v24 = vpop.eup %1079 }
0x116e   :  { %716 = vrot.lane.b32.xlu1 %v1080_v24, %s1099_s20 }
0x116f   :  { %v1082_v26 = vpop.eup %1081 }
0x1170   :  { %v710_v28 = vadd.f32 1.0, %v1082_v26 }
0x1172   :  { %1083 = vrcp.f32 %v710_v28 }
0x117c   :  { %v1084_v29 = vpop.eup %1083 }
0x117d   :  { %v714_v32 = vmul.f32 %v1084_v29, %v628_v11 }
0x11e0   :  { %v717_v30 = vpop.permute.xlu1 %716 }
0x11e1   :  { %v719_v31 = vmul.f32 %v1084_v29, %v717_v30 }
0x11e3   :  { %721 = vrot.lane.b32.xlu0 %v719_v31, %s1099_s20 }
0x1255   :  { %v722_v34 = vpop.permute.xlu0 %721 }
0x1256   :  { %v724_v35 = vadd.f32 %v722_v34, %v714_v32 }
0x1258   :  { %1085 = vtanh.f32 %v724_v35 }
0x1262   :  { %v1086_v36 = vpop.eup %1085 }
0x1263   :  { %727 = vrot.lane.b32.xlu1 %v1086_v36, %s1099_s20 }
0x12d5   :  { %v728_v37 = vpop.permute.xlu1 %727 }
0x12d6   :  { %v730_v38 = vmul.f32 %v1084_v29, %v728_v37 }
0x12d8   :  { %v731_v39 = vpack.c.bf16 %v730_v38, %v730_v38 }
0x12da   :  { %757 = vrot.lane.b32.xlu0 %v731_v39, %s1100_s21  ;;  %v739_v2 = vrot.slane %v731_v39, %v162_v59 }
0x12dc   :  { %v746_v6 = vrot.slane %v739_v2, %v162_v59 }
0x134c   :  { %v758_v40 = vpop.permute.xlu0 %757 }
0x134d   :  { %1021 = vmatmul.mubr.msk.bf16.vlgmr.msra.gmra.mrb[12].mxu1 %vm75_vm2, %v758_v40 }
0x1420   :  { %v796_v43 = vpop.f32.mrb[12].mxu1 }
0x1421   :  { %v802_v44 = vadd.f32 %v796_v43, %v754_v42  ;;  %v1022_v45 = vpop.f32.mrb[13].mxu1 }
0x1422   :  { %v799_v46 = vpop.f32.mrb[14].mxu1 }
0x1423   :  { %1087 = vtanh.f32 %v802_v44  ;;  %v1023_v47 = vpop.f32.mrb[15].mxu1  ;;  %v933_v50 = vmul.f32 -1.442695, %v802_v44 }
0x1425   :  { %1089 = vpow2.f32 %v933_v50 }
0x142d   :  { %v1088_v48 = vpop.eup %1087 }
0x142e   :  { %812 = vrot.lane.b32.xlu1 %v1088_v48, %s1099_s20 }
0x142f   :  { %v1090_v51 = vpop.eup %1089 }
0x1430   :  { %v806_v52 = vadd.f32 1.0, %v1090_v51 }
0x1432   :  { %1091 = vrcp.f32 %v806_v52 }
0x143c   :  { %v1092_v60 = vpop.eup %1091 }
0x143d   :  { %v810_v27 = vmul.f32 %v1092_v60, %v724_v35 }
0x14a0   :  { %v813_v61 = vpop.permute.xlu1 %812 }
0x14a1   :  { %v815_v63 = vmul.f32 %v1092_v60, %v813_v61 }
0x14a3   :  { %817 = vrot.lane.b32.xlu0 %v815_v63, %s1099_s20 }
0x14a7   :  { %171 = vrot.lane.b32.xlu0 %v170_v4, %s1100_s21 }
0x14ab   :  { %363 = vrot.lane.b32.xlu0 %v362_v5, %s1100_s21 }
0x14af   :  { %555 = vrot.lane.b32.xlu0 %v554_v1, %s1100_s21 }
0x14b3   :  { %747 = vrot.lane.b32.xlu0 %v746_v6, %s1100_s21 }
0x1515   :  { %v818_v7 = vpop.permute.xlu0 %817 }
0x1516   :  { %v820_v8 = vadd.f32 %v818_v7, %v810_v27 }
0x1518   :  { %1093 = vtanh.f32 %v820_v8  ;;  %v868_v30 = vrot.slane %v820_v8, %v854_v22 }
0x1519   :  { %v172_v10 = vpop.permute.xlu0 %171 }
0x151a   :  { %175 = vst.msk [vmem:[%s1332_s2] sm:$0x1] %vm174_vm3, %v172_v10 }
0x151d   :  { %v364_v56 = vpop.permute.xlu0 %363 }
0x151e   :  { %914 = vst.msk [vmem:[%s1332_s2 + $0x2] sm:$0x1] %vm174_vm3, %v364_v56 }
0x1521   :  { %v556_v11 = vpop.permute.xlu0 %555 }
0x1522   :  { %v1094_v12 = vpop.eup %1093  ;;  %922 = vst.msk [vmem:[%s1332_s2 + $0x4] sm:$0x1] %vm174_vm3, %v556_v11 }
0x1523   :  { %823 = vrot.lane.b32.xlu1 %v1094_v12, %s1099_s20 }
0x1525   :  { %v748_v14 = vpop.permute.xlu0 %747 }
0x1526   :  { %930 = vst.msk [vmem:[%s1332_s2 + $0x6] sm:$0x1] %vm174_vm3, %v748_v14 }
0x1527   :  { %267 = vrot.lane.b32.xlu1 %v266_v16, %s1100_s21 }
0x152b   :  { %459 = vrot.lane.b32.xlu1 %v458_v17, %s1100_s21 }
0x152f   :  { %651 = vrot.lane.b32.xlu1 %v650_v18, %s1100_s21 }
0x1595   :  { %v824_v21 = vpop.permute.xlu1 %823 }
0x1596   :  { %v826_v23 = vmul.f32 %v1092_v60, %v824_v21 }
0x1598   :  { %v827_v24 = vpack.c.bf16 %v826_v23, %v826_v23  ;;  %v855_v25 = vrot.slane %v826_v23, %v854_v22 }
0x1599   :  { %v268_v26 = vpop.permute.xlu1 %267 }
0x159a   :  { %v835_v28 = vrot.slane %v827_v24, %v162_v59  ;;  %910 = vst.msk [vmem:[%s1332_s2 + $0x1] sm:$0x1] %vm174_vm3, %v268_v26  ;;  %856 = vrot.lane.b32.xlu0 %v855_v25, %s1100_s21 }
0x159c   :  { %v842_v15 = vrot.slane %v835_v28, %v162_v59 }
0x159d   :  { %v460_v29 = vpop.permute.xlu1 %459 }
0x159e   :  { %918 = vst.msk [vmem:[%s1332_s2 + $0x3] sm:$0x1] %vm174_vm3, %v460_v29  ;;  %843 = vrot.lane.b32.xlu1 %v842_v15, %s1100_s21 }
0x15a1   :  { %v652_v31 = vpop.permute.xlu1 %651 }
0x15a2   :  { %926 = vst.msk [vmem:[%s1332_s2 + $0x5] sm:$0x1] %vm174_vm3, %v652_v31  ;;  %869 = vrot.lane.b32.xlu1 %v868_v30, %s1103_s23 }
0x160c   :  { %v857_v32 = vpop.permute.xlu0 %856 }
0x160d   :  { %860 = vst.msk [vmem:[#allocation4] sm:$0x3] %vm61_vm0, %v857_v32  ;;  %876 = vst.msk [vmem:[%s1333_s3] sm:$0x3] %vm61_vm0, %v857_v32 }
0x1610   :  { %v844_v34 = vpop.permute.xlu1 %843 }
0x1611   :  { %934 = vst.msk [vmem:[%s1332_s2 + $0x7] sm:$0x1] %vm174_vm3, %v844_v34 }
0x1614   :  { %v870_v35 = vpop.permute.xlu1 %869 }
0x1615   :  { %872 = vst.msk [vmem:[#allocation5] sm:$0x3] %vm61_vm0, %v870_v35  ;;  %877 = vst.msk [vmem:[%s1334_s4] sm:$0x3] %vm61_vm0, %v870_v35 }
0x1616   :  { %890 = vsyncmov [#allocation3] }
0x1619   :  { %s891_s29 = vpop.sfrf %890 }
0x161a   :  { %p935_p0 = scmp.ne.s32.totalorder %s891_s29, 0 }
0x161c   :  { %895 = shalt.err (%p935_p0)  }

</bundles_post_ra>
